<compile_context>
chip_gen: v7x
topology: tpu7x:2x2x1
jax: 0.10.0
libtpu: 0.0.40
codegen_flags: <defaults>
</compile_context>

<pallas_src>
import functools

import jax
import jax.numpy as jnp
from jax.experimental import pallas as pl
from jax.experimental.pallas import tpu as pltpu


def decoder_layer_kernel(
    x_ref, v_ref, k_ref, srcb_ref, tgtb_ref,
    wqkv_ref, wo_ref, bo_ref,
    g1_ref, be1_ref, g2_ref, be2_ref, g3_ref, be3_ref,
    wf1_ref, bf1_ref, wf2_ref, bf2_ref,
    out_ref, *, num_heads):
    f32 = jnp.float32
    bf16 = jnp.bfloat16
    _, S, E = x_ref.shape
    H = num_heads
    D = E // H

    x = x_ref[0]            # (S, E)  decoder input (f32)
    enc_v = v_ref[0]        # (S, E)  encoder "value" tensor (used as queries in cross-attn)
    enc_k = k_ref[0]        # (S, E)  encoder "key" tensor
    src_bias = srcb_ref[0]  # (S, S)  additive mask bias (0 / -1e20), precomputed
    tgt_bias = tgtb_ref[0]  # (S, S)

    wqkv = wqkv_ref[...]    # (E, 3E) bf16, block-diagonal per projection, 1/sqrt(E) folded in Q
    wo = wo_ref[...]        # (E, E)  bf16
    bo = bo_ref[...]        # (1, E)  f32

    def split_heads(t):     # (S, E) -> (H, S, D)  (static lane slices, no lane reshape)
        return jnp.stack([t[:, h * D:(h + 1) * D] for h in range(H)], axis=0)

    def merge_heads(t):     # (H, S, D) -> (S, E)
        return jnp.concatenate([t[h] for h in range(H)], axis=-1)

    def attention_core(q, k, v, bias):
        # q/k/v: (S, E) f32 already projected. All-head energy in one batched dot.
        q3 = split_heads(q.astype(bf16))          # (H, S, D)
        k3 = split_heads(k.astype(bf16))
        v3 = split_heads(v.astype(bf16))
        energy = jnp.einsum('hqd,hkd->hqk', q3, k3, preferred_element_type=f32)
        energy = energy + bias[None]              # mask bias applied once for all heads
        m = jnp.max(energy, axis=-1, keepdims=True)
        e = jnp.exp(energy - m)
        att = e * pl.reciprocal(jnp.sum(e, axis=-1, keepdims=True), approx=True)
        ctx = jnp.einsum('hqk,hkd->hqd', att.astype(bf16), v3,
                         preferred_element_type=f32)          # (H, S, D)
        out = jnp.dot(merge_heads(ctx).astype(bf16), wo, preferred_element_type=f32)
        return out + bo

    def layernorm(z, g, b):
        mean = jnp.mean(z, axis=-1, keepdims=True)
        var = jnp.mean((z - mean) ** 2, axis=-1, keepdims=True)
        return (z - mean) * jax.lax.rsqrt(var + 1e-5) * g + b

    # --- self attention: values=x, keys=x, queries=x, mask=tgt_mask ---
    # Single fused (S,E)@(E,3E) matmul gives Q|K|V for all heads at once.
    qkv = jnp.dot(x.astype(bf16), wqkv, preferred_element_type=f32)       # (S, 3E)
    attn = attention_core(qkv[:, 0:E], qkv[:, E:2 * E], qkv[:, 2 * E:3 * E], tgt_bias)
    x1 = layernorm(attn + x, g1_ref[...], be1_ref[...])      # dropout = identity

    # --- cross attention (reference reuses the SAME attention weights) ---
    #     self.attention(x1, key, value, src_mask) -> values=x1, keys=enc_k, queries=enc_v
    wq = wqkv[:, 0:E]
    wk = wqkv[:, E:2 * E]
    wv = wqkv[:, 2 * E:3 * E]
    q2 = jnp.dot(enc_v.astype(bf16), wq, preferred_element_type=f32)
    k2 = jnp.dot(enc_k.astype(bf16), wk, preferred_element_type=f32)
    v2 = jnp.dot(x1.astype(bf16), wv, preferred_element_type=f32)
    attn2 = attention_core(q2, k2, v2, src_bias)
    x2 = layernorm(attn2 + x1, g2_ref[...], be2_ref[...])    # dropout = identity

    # --- feed forward (bf16 matmuls, f32 accumulation) ---
    hidden = jnp.dot(x2.astype(bf16), wf1_ref[...],
                     preferred_element_type=f32) + bf1_ref[...]
    hidden = jnp.maximum(hidden, 0.0)
    ff = jnp.dot(hidden.astype(bf16), wf2_ref[...],
                 preferred_element_type=f32) + bf2_ref[...]
    out_ref[0] = layernorm(ff + x2, g3_ref[...], be3_ref[...])  # dropout = identity


def transformer_decoder_layer(x, value, key_t, src_mask, tgt_mask, p, num_heads):
    N, S, E = x.shape
    F = p["wf1"].shape[1]
    scale = 1.0 / (float(E) ** 0.5)

    # Pre-expand the shared per-head (D,D) projection weights to block-diagonal (E,E)
    # and fuse Q|K|V into one (E, 3E) matrix; fold 1/sqrt(E) into the Q columns.
    eye_h = jnp.eye(num_heads, dtype=jnp.float32)
    wq_bd = jnp.kron(eye_h, p["wq"]) * scale
    wk_bd = jnp.kron(eye_h, p["wk"])
    wv_bd = jnp.kron(eye_h, p["wv"])
    wqkv = jnp.concatenate([wq_bd, wk_bd, wv_bd], axis=1).astype(jnp.bfloat16)
    wo_bf = p["wo"].astype(jnp.bfloat16)
    wf1_bf = p["wf1"].astype(jnp.bfloat16)
    wf2_bf = p["wf2"].astype(jnp.bfloat16)

    # Masks -> additive f32 biases, computed once (shared across heads inside the kernel).
    neg = jnp.float32(-1e20)
    zero = jnp.float32(0.0)
    src_bias = jnp.where(src_mask == 0, neg, zero).astype(jnp.float32)
    tgt_bias = jnp.where(tgt_mask == 0, neg, zero).astype(jnp.float32)

    kernel = functools.partial(decoder_layer_kernel, num_heads=num_heads)

    def batched(shape):
        return pl.BlockSpec((1,) + shape, lambda b: (b,) + (0,) * len(shape))

    def replicated(shape):
        return pl.BlockSpec(shape, lambda b: (0,) * len(shape))

    in_specs = [
        batched((S, E)), batched((S, E)), batched((S, E)),
        batched((S, S)), batched((S, S)),
        replicated((E, 3 * E)), replicated((E, E)), replicated((1, E)),
        replicated((1, E)), replicated((1, E)),
        replicated((1, E)), replicated((1, E)),
        replicated((1, E)), replicated((1, E)),
        replicated((E, F)), replicated((1, F)),
        replicated((F, E)), replicated((1, E)),
    ]
    out_spec = pl.BlockSpec((1, S, E), lambda b: (b, 0, 0))

    return pl.pallas_call(
        kernel,
        out_shape=jax.ShapeDtypeStruct((N, S, E), jnp.float32),
        grid=(N,),
        in_specs=in_specs,
        out_specs=out_spec,
        compiler_params=pltpu.CompilerParams(dimension_semantics=("parallel",)),
    )(x, value, key_t, src_bias, tgt_bias,
      wqkv, wo_bf, p["bo"],
      p["g1"], p["be1"], p["g2"], p["be2"], p["g3"], p["be3"],
      wf1_bf, p["bf1"], wf2_bf, p["bf2"])


def reference_decoder_layer(x, value, key_t, src_mask, tgt_mask, p, num_heads):
    """Pure-JAX (f32) mirror of the PyTorch forward (eval mode) for verification."""
    N, S, E = x.shape
    D = E // num_heads

    def mha(v_in, k_in, q_in, mask):
        v = v_in.reshape(N, -1, num_heads, D) @ p["wv"]
        k = k_in.reshape(N, -1, num_heads, D) @ p["wk"]
        q = q_in.reshape(N, -1, num_heads, D) @ p["wq"]
        energy = jnp.einsum("nqhd,nkhd->nhqk", q, k)
        energy = jnp.where(mask[:, None, :, :] == 0, -1e20, energy)
        att = jax.nn.softmax(energy / (E ** 0.5), axis=3)
        out = jnp.einsum("nhql,nlhd->nqhd", att, v).reshape(N, -1, E)
        return out @ p["wo"] + p["bo"]

    def ln(z, g, b):
        m = z.mean(-1, keepdims=True)
        var = ((z - m) ** 2).mean(-1, keepdims=True)
        return (z - m) / jnp.sqrt(var + 1e-5) * g + b

    a = mha(x, x, x, tgt_mask)
    x1 = ln(a + x, p["g1"], p["be1"])
    a2 = mha(x1, key_t, value, src_mask)
    x2 = ln(a2 + x1, p["g2"], p["be2"])
    h = jax.nn.relu(x2 @ p["wf1"] + p["bf1"])
    ff = h @ p["wf2"] + p["bf2"]
    return ln(ff + x2, p["g3"], p["be3"])


if __name__ == "__main__":
    N, S, E, H, FE = 2, 8, 32, 4, 64
    D = E // H

    root = jax.random.PRNGKey(0)
    ks = jax.random.split(root, 20)

    x = jax.random.normal(ks[0], (N, S, E), jnp.float32)
    value = jax.random.normal(ks[1], (N, S, E), jnp.float32)   # encoder value
    key_t = jax.random.normal(ks[2], (N, S, E), jnp.float32)   # encoder key

    tgt_mask = jnp.broadcast_to(jnp.tril(jnp.ones((S, S), jnp.float32)), (N, S, S))
    src_mask = jnp.ones((N, S, S), jnp.float32)

    p = {
        "wq": 0.1 * jax.random.normal(ks[3], (D, D), jnp.float32),
        "wk": 0.1 * jax.random.normal(ks[4], (D, D), jnp.float32),
        "wv": 0.1 * jax.random.normal(ks[5], (D, D), jnp.float32),
        "wo": 0.1 * jax.random.normal(ks[6], (E, E), jnp.float32),
        "bo": 0.1 * jax.random.normal(ks[7], (1, E), jnp.float32),
        "g1": 1.0 + 0.1 * jax.random.normal(ks[8], (1, E), jnp.float32),
        "be1": 0.1 * jax.random.normal(ks[9], (1, E), jnp.float32),
        "g2": 1.0 + 0.1 * jax.random.normal(ks[10], (1, E), jnp.float32),
        "be2": 0.1 * jax.random.normal(ks[11], (1, E), jnp.float32),
        "g3": 1.0 + 0.1 * jax.random.normal(ks[12], (1, E), jnp.float32),
        "be3": 0.1 * jax.random.normal(ks[13], (1, E), jnp.float32),
        "wf1": 0.1 * jax.random.normal(ks[14], (E, FE), jnp.float32),
        "bf1": 0.1 * jax.random.normal(ks[15], (1, FE), jnp.float32),
        "wf2": 0.1 * jax.random.normal(ks[16], (FE, E), jnp.float32),
        "bf2": 0.1 * jax.random.normal(ks[17], (1, E), jnp.float32),
    }

    out = transformer_decoder_layer(x, value, key_t, src_mask, tgt_mask, p, H)
    out = jax.block_until_ready(out)

    ref = reference_decoder_layer(x, value, key_t, src_mask, tgt_mask, p, H)
    ref = jax.block_until_ready(ref)

    assert out.shape == (N, S, E)
    # bf16 matmul operands (f32 accumulation) + approx reciprocal -> relaxed tolerance
    # vs. the pure-f32 reference.
    assert jnp.allclose(out, ref, rtol=5e-2, atol=5e-2), (
        f"max abs diff = {float(jnp.max(jnp.abs(out - ref)))}")

    print("KERNEL_OK")
</pallas_src>

<mosaic_0001>
module attributes {stable_mosaic.version = 11 : i64} {
  func.func @decoder_layer_kernel(%arg0: i32, %arg1: memref<1x8x32xf32, #tpu.memory_space<vmem>>, %arg2: memref<1x8x32xf32, #tpu.memory_space<vmem>>, %arg3: memref<1x8x32xf32, #tpu.memory_space<vmem>>, %arg4: memref<1x8x8xf32, #tpu.memory_space<vmem>>, %arg5: memref<1x8x8xf32, #tpu.memory_space<vmem>>, %arg6: memref<32x96xbf16, #tpu.memory_space<vmem>>, %arg7: memref<32x32xbf16, #tpu.memory_space<vmem>>, %arg8: memref<1x32xf32, #tpu.memory_space<vmem>>, %arg9: memref<1x32xf32, #tpu.memory_space<vmem>>, %arg10: memref<1x32xf32, #tpu.memory_space<vmem>>, %arg11: memref<1x32xf32, #tpu.memory_space<vmem>>, %arg12: memref<1x32xf32, #tpu.memory_space<vmem>>, %arg13: memref<1x32xf32, #tpu.memory_space<vmem>>, %arg14: memref<1x32xf32, #tpu.memory_space<vmem>>, %arg15: memref<32x64xbf16, #tpu.memory_space<vmem>>, %arg16: memref<1x64xf32, #tpu.memory_space<vmem>>, %arg17: memref<64x32xbf16, #tpu.memory_space<vmem>>, %arg18: memref<1x32xf32, #tpu.memory_space<vmem>>, %arg19: memref<1x8x32xf32, #tpu.memory_space<vmem>>) attributes {dimension_semantics = [#tpu.dimension_semantics<parallel>], iteration_bounds = array<i64: 2>, scalar_prefetch = 0 : i64, scratch_operands = 0 : i64, tpu.core_type = #tpu.core_type<tc>, window_params = [{transform_indices = @transform_0, window_bounds = array<i64: 1, 8, 32>}, {transform_indices = @transform_1, window_bounds = array<i64: 1, 8, 32>}, {transform_indices = @transform_2, window_bounds = array<i64: 1, 8, 32>}, {transform_indices = @transform_3, window_bounds = array<i64: 1, 8, 8>}, {transform_indices = @transform_4, window_bounds = array<i64: 1, 8, 8>}, {pipeline_mode = #tpu.pipeline_mode<synchronous>, transform_indices = @transform_5, window_bounds = array<i64: 32, 96>}, {pipeline_mode = #tpu.pipeline_mode<synchronous>, transform_indices = @transform_6, window_bounds = array<i64: 32, 32>}, {pipeline_mode = #tpu.pipeline_mode<synchronous>, transform_indices = @transform_7, window_bounds = array<i64: 1, 32>}, {pipeline_mode = #tpu.pipeline_mode<synchronous>, transform_indices = @transform_8, window_bounds = array<i64: 1, 32>}, {pipeline_mode = #tpu.pipeline_mode<synchronous>, transform_indices = @transform_9, window_bounds = array<i64: 1, 32>}, {pipeline_mode = #tpu.pipeline_mode<synchronous>, transform_indices = @transform_10, window_bounds = array<i64: 1, 32>}, {pipeline_mode = #tpu.pipeline_mode<synchronous>, transform_indices = @transform_11, window_bounds = array<i64: 1, 32>}, {pipeline_mode = #tpu.pipeline_mode<synchronous>, transform_indices = @transform_12, window_bounds = array<i64: 1, 32>}, {pipeline_mode = #tpu.pipeline_mode<synchronous>, transform_indices = @transform_13, window_bounds = array<i64: 1, 32>}, {pipeline_mode = #tpu.pipeline_mode<synchronous>, transform_indices = @transform_14, window_bounds = array<i64: 32, 64>}, {pipeline_mode = #tpu.pipeline_mode<synchronous>, transform_indices = @transform_15, window_bounds = array<i64: 1, 64>}, {pipeline_mode = #tpu.pipeline_mode<synchronous>, transform_indices = @transform_16, window_bounds = array<i64: 64, 32>}, {pipeline_mode = #tpu.pipeline_mode<synchronous>, transform_indices = @transform_17, window_bounds = array<i64: 1, 32>}, {transform_indices = @transform_18, window_bounds = array<i64: 1, 8, 32>}]} {
    %c0 = arith.constant 0 : index
    %c0_0 = arith.constant 0 : index
    %c0_1 = arith.constant 0 : index
    %0 = vector.load %arg1[%c0, %c0_0, %c0_1] : memref<1x8x32xf32, #tpu.memory_space<vmem>>, vector<1x8x32xf32>
    %1 = vector.shape_cast %0 : vector<1x8x32xf32> to vector<8x32xf32>
    %c0_2 = arith.constant 0 : index
    %c0_3 = arith.constant 0 : index
    %c0_4 = arith.constant 0 : index
    %2 = vector.load %arg2[%c0_2, %c0_3, %c0_4] : memref<1x8x32xf32, #tpu.memory_space<vmem>>, vector<1x8x32xf32>
    %3 = vector.shape_cast %2 : vector<1x8x32xf32> to vector<8x32xf32>
    %c0_5 = arith.constant 0 : index
    %c0_6 = arith.constant 0 : index
    %c0_7 = arith.constant 0 : index
    %4 = vector.load %arg3[%c0_5, %c0_6, %c0_7] : memref<1x8x32xf32, #tpu.memory_space<vmem>>, vector<1x8x32xf32>
    %5 = vector.shape_cast %4 : vector<1x8x32xf32> to vector<8x32xf32>
    %c0_8 = arith.constant 0 : index
    %c0_9 = arith.constant 0 : index
    %c0_10 = arith.constant 0 : index
    %6 = vector.load %arg4[%c0_8, %c0_9, %c0_10] : memref<1x8x8xf32, #tpu.memory_space<vmem>>, vector<1x8x8xf32>
    %7 = vector.shape_cast %6 : vector<1x8x8xf32> to vector<8x8xf32>
    %c0_11 = arith.constant 0 : index
    %c0_12 = arith.constant 0 : index
    %c0_13 = arith.constant 0 : index
    %8 = vector.load %arg5[%c0_11, %c0_12, %c0_13] : memref<1x8x8xf32, #tpu.memory_space<vmem>>, vector<1x8x8xf32>
    %9 = vector.shape_cast %8 : vector<1x8x8xf32> to vector<8x8xf32>
    %c0_14 = arith.constant 0 : index
    %c0_15 = arith.constant 0 : index
    %10 = vector.load %arg6[%c0_14, %c0_15] : memref<32x96xbf16, #tpu.memory_space<vmem>>, vector<32x96xbf16>
    %c0_16 = arith.constant 0 : index
    %c0_17 = arith.constant 0 : index
    %11 = vector.load %arg7[%c0_16, %c0_17] : memref<32x32xbf16, #tpu.memory_space<vmem>>, vector<32x32xbf16>
    %c0_18 = arith.constant 0 : index
    %c0_19 = arith.constant 0 : index
    %12 = vector.load %arg8[%c0_18, %c0_19] : memref<1x32xf32, #tpu.memory_space<vmem>>, vector<1x32xf32>
    %13 = arith.truncf %1 : vector<8x32xf32> to vector<8x32xbf16>
    %cst = arith.constant dense<0.000000e+00> : vector<8x96xf32>
    %14 = tpu.matmul %13, %10, %cst {dimension_numbers = #tpu.dot_dimension_numbers<[1], [0], [0], [1], [0, 0, 1, 1], [], []>} : vector<8x32xbf16>, vector<32x96xbf16>, vector<8x96xf32> -> vector<8x96xf32>
    %15 = vector.extract_strided_slice %14 {offsets = [0, 0], sizes = [8, 32], strides = [1, 1]} : vector<8x96xf32> to vector<8x32xf32>
    %16 = vector.extract_strided_slice %14 {offsets = [0, 32], sizes = [8, 32], strides = [1, 1]} : vector<8x96xf32> to vector<8x32xf32>
    %17 = vector.extract_strided_slice %14 {offsets = [0, 64], sizes = [8, 32], strides = [1, 1]} : vector<8x96xf32> to vector<8x32xf32>
    %18 = arith.truncf %15 : vector<8x32xf32> to vector<8x32xbf16>
    %19 = vector.extract_strided_slice %18 {offsets = [0, 0], sizes = [8, 8], strides = [1, 1]} : vector<8x32xbf16> to vector<8x8xbf16>
    %20 = vector.extract_strided_slice %18 {offsets = [0, 8], sizes = [8, 8], strides = [1, 1]} : vector<8x32xbf16> to vector<8x8xbf16>
    %21 = vector.extract_strided_slice %18 {offsets = [0, 16], sizes = [8, 8], strides = [1, 1]} : vector<8x32xbf16> to vector<8x8xbf16>
    %22 = vector.extract_strided_slice %18 {offsets = [0, 24], sizes = [8, 8], strides = [1, 1]} : vector<8x32xbf16> to vector<8x8xbf16>
    %23 = vector.shape_cast %19 : vector<8x8xbf16> to vector<1x8x8xbf16>
    %24 = vector.shape_cast %20 : vector<8x8xbf16> to vector<1x8x8xbf16>
    %25 = vector.shape_cast %21 : vector<8x8xbf16> to vector<1x8x8xbf16>
    %26 = vector.shape_cast %22 : vector<8x8xbf16> to vector<1x8x8xbf16>
    %27 = tpu.concatenate %23, %24, %25, %26 in 0 : vector<1x8x8xbf16>, vector<1x8x8xbf16>, vector<1x8x8xbf16>, vector<1x8x8xbf16> -> vector<4x8x8xbf16>
    %28 = arith.truncf %16 : vector<8x32xf32> to vector<8x32xbf16>
    %29 = vector.extract_strided_slice %28 {offsets = [0, 0], sizes = [8, 8], strides = [1, 1]} : vector<8x32xbf16> to vector<8x8xbf16>
    %30 = vector.extract_strided_slice %28 {offsets = [0, 8], sizes = [8, 8], strides = [1, 1]} : vector<8x32xbf16> to vector<8x8xbf16>
    %31 = vector.extract_strided_slice %28 {offsets = [0, 16], sizes = [8, 8], strides = [1, 1]} : vector<8x32xbf16> to vector<8x8xbf16>
    %32 = vector.extract_strided_slice %28 {offsets = [0, 24], sizes = [8, 8], strides = [1, 1]} : vector<8x32xbf16> to vector<8x8xbf16>
    %33 = vector.shape_cast %29 : vector<8x8xbf16> to vector<1x8x8xbf16>
    %34 = vector.shape_cast %30 : vector<8x8xbf16> to vector<1x8x8xbf16>
    %35 = vector.shape_cast %31 : vector<8x8xbf16> to vector<1x8x8xbf16>
    %36 = vector.shape_cast %32 : vector<8x8xbf16> to vector<1x8x8xbf16>
    %37 = tpu.concatenate %33, %34, %35, %36 in 0 : vector<1x8x8xbf16>, vector<1x8x8xbf16>, vector<1x8x8xbf16>, vector<1x8x8xbf16> -> vector<4x8x8xbf16>
    %38 = arith.truncf %17 : vector<8x32xf32> to vector<8x32xbf16>
    %39 = vector.extract_strided_slice %38 {offsets = [0, 0], sizes = [8, 8], strides = [1, 1]} : vector<8x32xbf16> to vector<8x8xbf16>
    %40 = vector.extract_strided_slice %38 {offsets = [0, 8], sizes = [8, 8], strides = [1, 1]} : vector<8x32xbf16> to vector<8x8xbf16>
    %41 = vector.extract_strided_slice %38 {offsets = [0, 16], sizes = [8, 8], strides = [1, 1]} : vector<8x32xbf16> to vector<8x8xbf16>
    %42 = vector.extract_strided_slice %38 {offsets = [0, 24], sizes = [8, 8], strides = [1, 1]} : vector<8x32xbf16> to vector<8x8xbf16>
    %43 = vector.shape_cast %39 : vector<8x8xbf16> to vector<1x8x8xbf16>
    %44 = vector.shape_cast %40 : vector<8x8xbf16> to vector<1x8x8xbf16>
    %45 = vector.shape_cast %41 : vector<8x8xbf16> to vector<1x8x8xbf16>
    %46 = vector.shape_cast %42 : vector<8x8xbf16> to vector<1x8x8xbf16>
    %47 = tpu.concatenate %43, %44, %45, %46 in 0 : vector<1x8x8xbf16>, vector<1x8x8xbf16>, vector<1x8x8xbf16>, vector<1x8x8xbf16> -> vector<4x8x8xbf16>
    "tpu.trace_start"() <{level = 10 : i32, message = "hqd,hkd->hqk"}> : () -> ()
    %cst_20 = arith.constant dense<0.000000e+00> : vector<4x8x8xf32>
    %48 = tpu.matmul %27, %37, %cst_20 {dimension_numbers = #tpu.dot_dimension_numbers<[2], [2], [1], [1], [0, 0, 0, 1, 1, 1], [0], [0]>} : vector<4x8x8xbf16>, vector<4x8x8xbf16>, vector<4x8x8xf32> -> vector<4x8x8xf32>
    "tpu.trace_stop"() : () -> ()
    %49 = vector.shape_cast %9 : vector<8x8xf32> to vector<1x8x8xf32>
    %50 = vector.broadcast %49 : vector<1x8x8xf32> to vector<4x8x8xf32>
    %51 = arith.addf %48, %50 : vector<4x8x8xf32>
    %cst_21 = arith.constant dense<0xFF800000> : vector<4x8xf32>
    %52 = vector.multi_reduction <maximumf>, %51, %cst_21 [2] : vector<4x8x8xf32> to vector<4x8xf32>
    %53 = vector.shape_cast %52 : vector<4x8xf32> to vector<4x8x1xf32>
    %54 = vector.broadcast %53 : vector<4x8x1xf32> to vector<4x8x8xf32>
    %55 = arith.subf %51, %54 : vector<4x8x8xf32>
    %56 = math.exp %55 : vector<4x8x8xf32>
    %cst_22 = arith.constant dense<0.000000e+00> : vector<4x8xf32>
    %57 = vector.multi_reduction <add>, %56, %cst_22 [2] : vector<4x8x8xf32> to vector<4x8xf32>
    %58 = vector.shape_cast %57 : vector<4x8xf32> to vector<4x8x1xf32>
    %59 = tpu.reciprocal %58 {approx = true} : vector<4x8x1xf32> -> vector<4x8x1xf32>
    %60 = vector.broadcast %59 : vector<4x8x1xf32> to vector<4x8x8xf32>
    %61 = arith.mulf %56, %60 : vector<4x8x8xf32>
    %62 = arith.truncf %61 : vector<4x8x8xf32> to vector<4x8x8xbf16>
    "tpu.trace_start"() <{level = 10 : i32, message = "hqk,hkd->hqd"}> : () -> ()
    %cst_23 = arith.constant dense<0.000000e+00> : vector<4x8x8xf32>
    %63 = tpu.matmul %62, %47, %cst_23 {dimension_numbers = #tpu.dot_dimension_numbers<[2], [1], [1], [2], [0, 0, 0, 1, 1, 2], [0], [0]>} : vector<4x8x8xbf16>, vector<4x8x8xbf16>, vector<4x8x8xf32> -> vector<4x8x8xf32>
    "tpu.trace_stop"() : () -> ()
    %64 = vector.extract_strided_slice %63 {offsets = [0, 0, 0], sizes = [1, 8, 8], strides = [1, 1, 1]} : vector<4x8x8xf32> to vector<1x8x8xf32>
    %65 = vector.shape_cast %64 : vector<1x8x8xf32> to vector<8x8xf32>
    %66 = vector.extract_strided_slice %63 {offsets = [1, 0, 0], sizes = [1, 8, 8], strides = [1, 1, 1]} : vector<4x8x8xf32> to vector<1x8x8xf32>
    %67 = vector.shape_cast %66 : vector<1x8x8xf32> to vector<8x8xf32>
    %68 = vector.extract_strided_slice %63 {offsets = [2, 0, 0], sizes = [1, 8, 8], strides = [1, 1, 1]} : vector<4x8x8xf32> to vector<1x8x8xf32>
    %69 = vector.shape_cast %68 : vector<1x8x8xf32> to vector<8x8xf32>
    %70 = vector.extract_strided_slice %63 {offsets = [3, 0, 0], sizes = [1, 8, 8], strides = [1, 1, 1]} : vector<4x8x8xf32> to vector<1x8x8xf32>
    %71 = vector.shape_cast %70 : vector<1x8x8xf32> to vector<8x8xf32>
    %72 = tpu.concatenate %65, %67, %69, %71 in 1 : vector<8x8xf32>, vector<8x8xf32>, vector<8x8xf32>, vector<8x8xf32> -> vector<8x32xf32>
    %73 = arith.truncf %72 : vector<8x32xf32> to vector<8x32xbf16>
    %cst_24 = arith.constant dense<0.000000e+00> : vector<8x32xf32>
    %74 = tpu.matmul %73, %11, %cst_24 {dimension_numbers = #tpu.dot_dimension_numbers<[1], [0], [0], [1], [0, 0, 1, 1], [], []>} : vector<8x32xbf16>, vector<32x32xbf16>, vector<8x32xf32> -> vector<8x32xf32>
    %75 = vector.broadcast %12 : vector<1x32xf32> to vector<8x32xf32>
    %76 = arith.addf %74, %75 : vector<8x32xf32>
    %77 = arith.addf %76, %1 : vector<8x32xf32>
    %c0_25 = arith.constant 0 : index
    %c0_26 = arith.constant 0 : index
    %78 = vector.load %arg9[%c0_25, %c0_26] : memref<1x32xf32, #tpu.memory_space<vmem>>, vector<1x32xf32>
    %c0_27 = arith.constant 0 : index
    %c0_28 = arith.constant 0 : index
    %79 = vector.load %arg10[%c0_27, %c0_28] : memref<1x32xf32, #tpu.memory_space<vmem>>, vector<1x32xf32>
    %cst_29 = arith.constant dense<0.000000e+00> : vector<8xf32>
    %80 = vector.multi_reduction <add>, %77, %cst_29 [1] : vector<8x32xf32> to vector<8xf32>
    %81 = vector.shape_cast %80 : vector<8xf32> to vector<8x1xf32>
    %cst_30 = arith.constant 3.200000e+01 : f32
    %82 = vector.broadcast %cst_30 : f32 to vector<8x1xf32>
    %83 = arith.divf %81, %82 : vector<8x1xf32>
    %84 = vector.broadcast %83 : vector<8x1xf32> to vector<8x32xf32>
    %85 = arith.subf %77, %84 : vector<8x32xf32>
    %86 = arith.mulf %85, %85 : vector<8x32xf32>
    %cst_31 = arith.constant dense<0.000000e+00> : vector<8xf32>
    %87 = vector.multi_reduction <add>, %86, %cst_31 [1] : vector<8x32xf32> to vector<8xf32>
    %88 = vector.shape_cast %87 : vector<8xf32> to vector<8x1xf32>
    %cst_32 = arith.constant 3.200000e+01 : f32
    %89 = vector.broadcast %cst_32 : f32 to vector<8x1xf32>
    %90 = arith.divf %88, %89 : vector<8x1xf32>
    %91 = vector.broadcast %83 : vector<8x1xf32> to vector<8x32xf32>
    %92 = arith.subf %77, %91 : vector<8x32xf32>
    %cst_33 = arith.constant 9.99999974E-6 : f32
    %93 = vector.broadcast %cst_33 : f32 to vector<8x1xf32>
    %94 = arith.addf %90, %93 : vector<8x1xf32>
    %95 = math.rsqrt %94 : vector<8x1xf32>
    %96 = vector.broadcast %95 : vector<8x1xf32> to vector<8x32xf32>
    %97 = arith.mulf %92, %96 : vector<8x32xf32>
    %98 = vector.broadcast %78 : vector<1x32xf32> to vector<8x32xf32>
    %99 = arith.mulf %97, %98 : vector<8x32xf32>
    %100 = vector.broadcast %79 : vector<1x32xf32> to vector<8x32xf32>
    %101 = arith.addf %99, %100 : vector<8x32xf32>
    %102 = vector.extract_strided_slice %10 {offsets = [0, 0], sizes = [32, 32], strides = [1, 1]} : vector<32x96xbf16> to vector<32x32xbf16>
    %103 = vector.extract_strided_slice %10 {offsets = [0, 32], sizes = [32, 32], strides = [1, 1]} : vector<32x96xbf16> to vector<32x32xbf16>
    %104 = vector.extract_strided_slice %10 {offsets = [0, 64], sizes = [32, 32], strides = [1, 1]} : vector<32x96xbf16> to vector<32x32xbf16>
    %105 = arith.truncf %3 : vector<8x32xf32> to vector<8x32xbf16>
    %cst_34 = arith.constant dense<0.000000e+00> : vector<8x32xf32>
    %106 = tpu.matmul %105, %102, %cst_34 {dimension_numbers = #tpu.dot_dimension_numbers<[1], [0], [0], [1], [0, 0, 1, 1], [], []>} : vector<8x32xbf16>, vector<32x32xbf16>, vector<8x32xf32> -> vector<8x32xf32>
    %107 = arith.truncf %5 : vector<8x32xf32> to vector<8x32xbf16>
    %cst_35 = arith.constant dense<0.000000e+00> : vector<8x32xf32>
    %108 = tpu.matmul %107, %103, %cst_35 {dimension_numbers = #tpu.dot_dimension_numbers<[1], [0], [0], [1], [0, 0, 1, 1], [], []>} : vector<8x32xbf16>, vector<32x32xbf16>, vector<8x32xf32> -> vector<8x32xf32>
    %109 = arith.truncf %101 : vector<8x32xf32> to vector<8x32xbf16>
    %cst_36 = arith.constant dense<0.000000e+00> : vector<8x32xf32>
    %110 = tpu.matmul %109, %104, %cst_36 {dimension_numbers = #tpu.dot_dimension_numbers<[1], [0], [0], [1], [0, 0, 1, 1], [], []>} : vector<8x32xbf16>, vector<32x32xbf16>, vector<8x32xf32> -> vector<8x32xf32>
    %111 = arith.truncf %106 : vector<8x32xf32> to vector<8x32xbf16>
    %112 = vector.extract_strided_slice %111 {offsets = [0, 0], sizes = [8, 8], strides = [1, 1]} : vector<8x32xbf16> to vector<8x8xbf16>
    %113 = vector.extract_strided_slice %111 {offsets = [0, 8], sizes = [8, 8], strides = [1, 1]} : vector<8x32xbf16> to vector<8x8xbf16>
    %114 = vector.extract_strided_slice %111 {offsets = [0, 16], sizes = [8, 8], strides = [1, 1]} : vector<8x32xbf16> to vector<8x8xbf16>
    %115 = vector.extract_strided_slice %111 {offsets = [0, 24], sizes = [8, 8], strides = [1, 1]} : vector<8x32xbf16> to vector<8x8xbf16>
    %116 = vector.shape_cast %112 : vector<8x8xbf16> to vector<1x8x8xbf16>
    %117 = vector.shape_cast %113 : vector<8x8xbf16> to vector<1x8x8xbf16>
    %118 = vector.shape_cast %114 : vector<8x8xbf16> to vector<1x8x8xbf16>
    %119 = vector.shape_cast %115 : vector<8x8xbf16> to vector<1x8x8xbf16>
    %120 = tpu.concatenate %116, %117, %118, %119 in 0 : vector<1x8x8xbf16>, vector<1x8x8xbf16>, vector<1x8x8xbf16>, vector<1x8x8xbf16> -> vector<4x8x8xbf16>
    %121 = arith.truncf %108 : vector<8x32xf32> to vector<8x32xbf16>
    %122 = vector.extract_strided_slice %121 {offsets = [0, 0], sizes = [8, 8], strides = [1, 1]} : vector<8x32xbf16> to vector<8x8xbf16>
    %123 = vector.extract_strided_slice %121 {offsets = [0, 8], sizes = [8, 8], strides = [1, 1]} : vector<8x32xbf16> to vector<8x8xbf16>
    %124 = vector.extract_strided_slice %121 {offsets = [0, 16], sizes = [8, 8], strides = [1, 1]} : vector<8x32xbf16> to vector<8x8xbf16>
    %125 = vector.extract_strided_slice %121 {offsets = [0, 24], sizes = [8, 8], strides = [1, 1]} : vector<8x32xbf16> to vector<8x8xbf16>
    %126 = vector.shape_cast %122 : vector<8x8xbf16> to vector<1x8x8xbf16>
    %127 = vector.shape_cast %123 : vector<8x8xbf16> to vector<1x8x8xbf16>
    %128 = vector.shape_cast %124 : vector<8x8xbf16> to vector<1x8x8xbf16>
    %129 = vector.shape_cast %125 : vector<8x8xbf16> to vector<1x8x8xbf16>
    %130 = tpu.concatenate %126, %127, %128, %129 in 0 : vector<1x8x8xbf16>, vector<1x8x8xbf16>, vector<1x8x8xbf16>, vector<1x8x8xbf16> -> vector<4x8x8xbf16>
    %131 = arith.truncf %110 : vector<8x32xf32> to vector<8x32xbf16>
    %132 = vector.extract_strided_slice %131 {offsets = [0, 0], sizes = [8, 8], strides = [1, 1]} : vector<8x32xbf16> to vector<8x8xbf16>
    %133 = vector.extract_strided_slice %131 {offsets = [0, 8], sizes = [8, 8], strides = [1, 1]} : vector<8x32xbf16> to vector<8x8xbf16>
    %134 = vector.extract_strided_slice %131 {offsets = [0, 16], sizes = [8, 8], strides = [1, 1]} : vector<8x32xbf16> to vector<8x8xbf16>
    %135 = vector.extract_strided_slice %131 {offsets = [0, 24], sizes = [8, 8], strides = [1, 1]} : vector<8x32xbf16> to vector<8x8xbf16>
    %136 = vector.shape_cast %132 : vector<8x8xbf16> to vector<1x8x8xbf16>
    %137 = vector.shape_cast %133 : vector<8x8xbf16> to vector<1x8x8xbf16>
    %138 = vector.shape_cast %134 : vector<8x8xbf16> to vector<1x8x8xbf16>
    %139 = vector.shape_cast %135 : vector<8x8xbf16> to vector<1x8x8xbf16>
    %140 = tpu.concatenate %136, %137, %138, %139 in 0 : vector<1x8x8xbf16>, vector<1x8x8xbf16>, vector<1x8x8xbf16>, vector<1x8x8xbf16> -> vector<4x8x8xbf16>
    "tpu.trace_start"() <{level = 10 : i32, message = "hqd,hkd->hqk"}> : () -> ()
    %cst_37 = arith.constant dense<0.000000e+00> : vector<4x8x8xf32>
    %141 = tpu.matmul %120, %130, %cst_37 {dimension_numbers = #tpu.dot_dimension_numbers<[2], [2], [1], [1], [0, 0, 0, 1, 1, 1], [0], [0]>} : vector<4x8x8xbf16>, vector<4x8x8xbf16>, vector<4x8x8xf32> -> vector<4x8x8xf32>
    "tpu.trace_stop"() : () -> ()
    %142 = vector.shape_cast %7 : vector<8x8xf32> to vector<1x8x8xf32>
    %143 = vector.broadcast %142 : vector<1x8x8xf32> to vector<4x8x8xf32>
    %144 = arith.addf %141, %143 : vector<4x8x8xf32>
    %cst_38 = arith.constant dense<0xFF800000> : vector<4x8xf32>
    %145 = vector.multi_reduction <maximumf>, %144, %cst_38 [2] : vector<4x8x8xf32> to vector<4x8xf32>
    %146 = vector.shape_cast %145 : vector<4x8xf32> to vector<4x8x1xf32>
    %147 = vector.broadcast %146 : vector<4x8x1xf32> to vector<4x8x8xf32>
    %148 = arith.subf %144, %147 : vector<4x8x8xf32>
    %149 = math.exp %148 : vector<4x8x8xf32>
    %cst_39 = arith.constant dense<0.000000e+00> : vector<4x8xf32>
    %150 = vector.multi_reduction <add>, %149, %cst_39 [2] : vector<4x8x8xf32> to vector<4x8xf32>
    %151 = vector.shape_cast %150 : vector<4x8xf32> to vector<4x8x1xf32>
    %152 = tpu.reciprocal %151 {approx = true} : vector<4x8x1xf32> -> vector<4x8x1xf32>
    %153 = vector.broadcast %152 : vector<4x8x1xf32> to vector<4x8x8xf32>
    %154 = arith.mulf %149, %153 : vector<4x8x8xf32>
    %155 = arith.truncf %154 : vector<4x8x8xf32> to vector<4x8x8xbf16>
    "tpu.trace_start"() <{level = 10 : i32, message = "hqk,hkd->hqd"}> : () -> ()
    %cst_40 = arith.constant dense<0.000000e+00> : vector<4x8x8xf32>
    %156 = tpu.matmul %155, %140, %cst_40 {dimension_numbers = #tpu.dot_dimension_numbers<[2], [1], [1], [2], [0, 0, 0, 1, 1, 2], [0], [0]>} : vector<4x8x8xbf16>, vector<4x8x8xbf16>, vector<4x8x8xf32> -> vector<4x8x8xf32>
    "tpu.trace_stop"() : () -> ()
    %157 = vector.extract_strided_slice %156 {offsets = [0, 0, 0], sizes = [1, 8, 8], strides = [1, 1, 1]} : vector<4x8x8xf32> to vector<1x8x8xf32>
    %158 = vector.shape_cast %157 : vector<1x8x8xf32> to vector<8x8xf32>
    %159 = vector.extract_strided_slice %156 {offsets = [1, 0, 0], sizes = [1, 8, 8], strides = [1, 1, 1]} : vector<4x8x8xf32> to vector<1x8x8xf32>
    %160 = vector.shape_cast %159 : vector<1x8x8xf32> to vector<8x8xf32>
    %161 = vector.extract_strided_slice %156 {offsets = [2, 0, 0], sizes = [1, 8, 8], strides = [1, 1, 1]} : vector<4x8x8xf32> to vector<1x8x8xf32>
    %162 = vector.shape_cast %161 : vector<1x8x8xf32> to vector<8x8xf32>
    %163 = vector.extract_strided_slice %156 {offsets = [3, 0, 0], sizes = [1, 8, 8], strides = [1, 1, 1]} : vector<4x8x8xf32> to vector<1x8x8xf32>
    %164 = vector.shape_cast %163 : vector<1x8x8xf32> to vector<8x8xf32>
    %165 = tpu.concatenate %158, %160, %162, %164 in 1 : vector<8x8xf32>, vector<8x8xf32>, vector<8x8xf32>, vector<8x8xf32> -> vector<8x32xf32>
    %166 = arith.truncf %165 : vector<8x32xf32> to vector<8x32xbf16>
    %cst_41 = arith.constant dense<0.000000e+00> : vector<8x32xf32>
    %167 = tpu.matmul %166, %11, %cst_41 {dimension_numbers = #tpu.dot_dimension_numbers<[1], [0], [0], [1], [0, 0, 1, 1], [], []>} : vector<8x32xbf16>, vector<32x32xbf16>, vector<8x32xf32> -> vector<8x32xf32>
    %168 = vector.broadcast %12 : vector<1x32xf32> to vector<8x32xf32>
    %169 = arith.addf %167, %168 : vector<8x32xf32>
    %170 = arith.addf %169, %101 : vector<8x32xf32>
    %c0_42 = arith.constant 0 : index
    %c0_43 = arith.constant 0 : index
    %171 = vector.load %arg11[%c0_42, %c0_43] : memref<1x32xf32, #tpu.memory_space<vmem>>, vector<1x32xf32>
    %c0_44 = arith.constant 0 : index
    %c0_45 = arith.constant 0 : index
    %172 = vector.load %arg12[%c0_44, %c0_45] : memref<1x32xf32, #tpu.memory_space<vmem>>, vector<1x32xf32>
    %cst_46 = arith.constant dense<0.000000e+00> : vector<8xf32>
    %173 = vector.multi_reduction <add>, %170, %cst_46 [1] : vector<8x32xf32> to vector<8xf32>
    %174 = vector.shape_cast %173 : vector<8xf32> to vector<8x1xf32>
    %cst_47 = arith.constant 3.200000e+01 : f32
    %175 = vector.broadcast %cst_47 : f32 to vector<8x1xf32>
    %176 = arith.divf %174, %175 : vector<8x1xf32>
    %177 = vector.broadcast %176 : vector<8x1xf32> to vector<8x32xf32>
    %178 = arith.subf %170, %177 : vector<8x32xf32>
    %179 = arith.mulf %178, %178 : vector<8x32xf32>
    %cst_48 = arith.constant dense<0.000000e+00> : vector<8xf32>
    %180 = vector.multi_reduction <add>, %179, %cst_48 [1] : vector<8x32xf32> to vector<8xf32>
    %181 = vector.shape_cast %180 : vector<8xf32> to vector<8x1xf32>
    %cst_49 = arith.constant 3.200000e+01 : f32
    %182 = vector.broadcast %cst_49 : f32 to vector<8x1xf32>
    %183 = arith.divf %181, %182 : vector<8x1xf32>
    %184 = vector.broadcast %176 : vector<8x1xf32> to vector<8x32xf32>
    %185 = arith.subf %170, %184 : vector<8x32xf32>
    %cst_50 = arith.constant 9.99999974E-6 : f32
    %186 = vector.broadcast %cst_50 : f32 to vector<8x1xf32>
    %187 = arith.addf %183, %186 : vector<8x1xf32>
    %188 = math.rsqrt %187 : vector<8x1xf32>
    %189 = vector.broadcast %188 : vector<8x1xf32> to vector<8x32xf32>
    %190 = arith.mulf %185, %189 : vector<8x32xf32>
    %191 = vector.broadcast %171 : vector<1x32xf32> to vector<8x32xf32>
    %192 = arith.mulf %190, %191 : vector<8x32xf32>
    %193 = vector.broadcast %172 : vector<1x32xf32> to vector<8x32xf32>
    %194 = arith.addf %192, %193 : vector<8x32xf32>
    %195 = arith.truncf %194 : vector<8x32xf32> to vector<8x32xbf16>
    %c0_51 = arith.constant 0 : index
    %c0_52 = arith.constant 0 : index
    %196 = vector.load %arg15[%c0_51, %c0_52] : memref<32x64xbf16, #tpu.memory_space<vmem>>, vector<32x64xbf16>
    %cst_53 = arith.constant dense<0.000000e+00> : vector<8x64xf32>
    %197 = tpu.matmul %195, %196, %cst_53 {dimension_numbers = #tpu.dot_dimension_numbers<[1], [0], [0], [1], [0, 0, 1, 1], [], []>} : vector<8x32xbf16>, vector<32x64xbf16>, vector<8x64xf32> -> vector<8x64xf32>
    %c0_54 = arith.constant 0 : index
    %c0_55 = arith.constant 0 : index
    %198 = vector.load %arg16[%c0_54, %c0_55] : memref<1x64xf32, #tpu.memory_space<vmem>>, vector<1x64xf32>
    %199 = vector.broadcast %198 : vector<1x64xf32> to vector<8x64xf32>
    %200 = arith.addf %197, %199 : vector<8x64xf32>
    %cst_56 = arith.constant 0.000000e+00 : f32
    %201 = vector.broadcast %cst_56 : f32 to vector<8x64xf32>
    %202 = arith.maximumf %200, %201 : vector<8x64xf32>
    %203 = arith.truncf %202 : vector<8x64xf32> to vector<8x64xbf16>
    %c0_57 = arith.constant 0 : index
    %c0_58 = arith.constant 0 : index
    %204 = vector.load %arg17[%c0_57, %c0_58] : memref<64x32xbf16, #tpu.memory_space<vmem>>, vector<64x32xbf16>
    %cst_59 = arith.constant dense<0.000000e+00> : vector<8x32xf32>
    %205 = tpu.matmul %203, %204, %cst_59 {dimension_numbers = #tpu.dot_dimension_numbers<[1], [0], [0], [1], [0, 0, 1, 1], [], []>} : vector<8x64xbf16>, vector<64x32xbf16>, vector<8x32xf32> -> vector<8x32xf32>
    %c0_60 = arith.constant 0 : index
    %c0_61 = arith.constant 0 : index
    %206 = vector.load %arg18[%c0_60, %c0_61] : memref<1x32xf32, #tpu.memory_space<vmem>>, vector<1x32xf32>
    %207 = vector.broadcast %206 : vector<1x32xf32> to vector<8x32xf32>
    %208 = arith.addf %205, %207 : vector<8x32xf32>
    %209 = arith.addf %208, %194 : vector<8x32xf32>
    %c0_62 = arith.constant 0 : index
    %c0_63 = arith.constant 0 : index
    %210 = vector.load %arg13[%c0_62, %c0_63] : memref<1x32xf32, #tpu.memory_space<vmem>>, vector<1x32xf32>
    %c0_64 = arith.constant 0 : index
    %c0_65 = arith.constant 0 : index
    %211 = vector.load %arg14[%c0_64, %c0_65] : memref<1x32xf32, #tpu.memory_space<vmem>>, vector<1x32xf32>
    %cst_66 = arith.constant dense<0.000000e+00> : vector<8xf32>
    %212 = vector.multi_reduction <add>, %209, %cst_66 [1] : vector<8x32xf32> to vector<8xf32>
    %213 = vector.shape_cast %212 : vector<8xf32> to vector<8x1xf32>
    %cst_67 = arith.constant 3.200000e+01 : f32
    %214 = vector.broadcast %cst_67 : f32 to vector<8x1xf32>
    %215 = arith.divf %213, %214 : vector<8x1xf32>
    %216 = vector.broadcast %215 : vector<8x1xf32> to vector<8x32xf32>
    %217 = arith.subf %209, %216 : vector<8x32xf32>
    %218 = arith.mulf %217, %217 : vector<8x32xf32>
    %cst_68 = arith.constant dense<0.000000e+00> : vector<8xf32>
    %219 = vector.multi_reduction <add>, %218, %cst_68 [1] : vector<8x32xf32> to vector<8xf32>
    %220 = vector.shape_cast %219 : vector<8xf32> to vector<8x1xf32>
    %cst_69 = arith.constant 3.200000e+01 : f32
    %221 = vector.broadcast %cst_69 : f32 to vector<8x1xf32>
    %222 = arith.divf %220, %221 : vector<8x1xf32>
    %223 = vector.broadcast %215 : vector<8x1xf32> to vector<8x32xf32>
    %224 = arith.subf %209, %223 : vector<8x32xf32>
    %cst_70 = arith.constant 9.99999974E-6 : f32
    %225 = vector.broadcast %cst_70 : f32 to vector<8x1xf32>
    %226 = arith.addf %222, %225 : vector<8x1xf32>
    %227 = math.rsqrt %226 : vector<8x1xf32>
    %228 = vector.broadcast %227 : vector<8x1xf32> to vector<8x32xf32>
    %229 = arith.mulf %224, %228 : vector<8x32xf32>
    %230 = vector.broadcast %210 : vector<1x32xf32> to vector<8x32xf32>
    %231 = arith.mulf %229, %230 : vector<8x32xf32>
    %232 = vector.broadcast %211 : vector<1x32xf32> to vector<8x32xf32>
    %233 = arith.addf %231, %232 : vector<8x32xf32>
    %c0_71 = arith.constant 0 : index
    %c0_72 = arith.constant 0 : index
    %c0_73 = arith.constant 0 : index
    %234 = vector.load %arg19[%c0_71, %c0_72, %c0_73] : memref<1x8x32xf32, #tpu.memory_space<vmem>>, vector<1x8x32xf32>
    %235 = vector.shape_cast %234 : vector<1x8x32xf32> to vector<8x32xf32>
    %236 = vector.shape_cast %233 : vector<8x32xf32> to vector<1x8x32xf32>
    tpu.vector_store %arg19[%c0_71, %c0_72, %c0_73], %236 {strides = array<i32>} : memref<1x8x32xf32, #tpu.memory_space<vmem>>, vector<1x8x32xf32>,
    return
  }
  func.func @transform_0(%arg0: i32) -> (i32, i32, i32) {
    %c0_i32 = arith.constant 0 : i32
    %c0_i32_0 = arith.constant 0 : i32
    %c0_i32_1 = arith.constant 0 : i32
    return %arg0, %c0_i32, %c0_i32_0 : i32, i32, i32
  }
  func.func @transform_1(%arg0: i32) -> (i32, i32, i32) {
    %c0_i32 = arith.constant 0 : i32
    %c0_i32_0 = arith.constant 0 : i32
    %c0_i32_1 = arith.constant 0 : i32
    return %arg0, %c0_i32, %c0_i32_0 : i32, i32, i32
  }
  func.func @transform_2(%arg0: i32) -> (i32, i32, i32) {
    %c0_i32 = arith.constant 0 : i32
    %c0_i32_0 = arith.constant 0 : i32
    %c0_i32_1 = arith.constant 0 : i32
    return %arg0, %c0_i32, %c0_i32_0 : i32, i32, i32
  }
  func.func @transform_3(%arg0: i32) -> (i32, i32, i32) {
    %c0_i32 = arith.constant 0 : i32
    %c0_i32_0 = arith.constant 0 : i32
    %c0_i32_1 = arith.constant 0 : i32
    return %arg0, %c0_i32, %c0_i32_0 : i32, i32, i32
  }
  func.func @transform_4(%arg0: i32) -> (i32, i32, i32) {
    %c0_i32 = arith.constant 0 : i32
    %c0_i32_0 = arith.constant 0 : i32
    %c0_i32_1 = arith.constant 0 : i32
    return %arg0, %c0_i32, %c0_i32_0 : i32, i32, i32
  }
  func.func @transform_5(%arg0: i32) -> (i32, i32) {
    %c0_i32 = arith.constant 0 : i32
    %c0_i32_0 = arith.constant 0 : i32
    %c0_i32_1 = arith.constant 0 : i32
    return %c0_i32, %c0_i32_0 : i32, i32
  }
  func.func @transform_6(%arg0: i32) -> (i32, i32) {
    %c0_i32 = arith.constant 0 : i32
    %c0_i32_0 = arith.constant 0 : i32
    %c0_i32_1 = arith.constant 0 : i32
    return %c0_i32, %c0_i32_0 : i32, i32
  }
  func.func @transform_7(%arg0: i32) -> (i32, i32) {
    %c0_i32 = arith.constant 0 : i32
    %c0_i32_0 = arith.constant 0 : i32
    %c0_i32_1 = arith.constant 0 : i32
    return %c0_i32, %c0_i32_0 : i32, i32
  }
  func.func @transform_8(%arg0: i32) -> (i32, i32) {
    %c0_i32 = arith.constant 0 : i32
    %c0_i32_0 = arith.constant 0 : i32
    %c0_i32_1 = arith.constant 0 : i32
    return %c0_i32, %c0_i32_0 : i32, i32
  }
  func.func @transform_9(%arg0: i32) -> (i32, i32) {
    %c0_i32 = arith.constant 0 : i32
    %c0_i32_0 = arith.constant 0 : i32
    %c0_i32_1 = arith.constant 0 : i32
    return %c0_i32, %c0_i32_0 : i32, i32
  }
  func.func @transform_10(%arg0: i32) -> (i32, i32) {
    %c0_i32 = arith.constant 0 : i32
    %c0_i32_0 = arith.constant 0 : i32
    %c0_i32_1 = arith.constant 0 : i32
    return %c0_i32, %c0_i32_0 : i32, i32
  }
  func.func @transform_11(%arg0: i32) -> (i32, i32) {
    %c0_i32 = arith.constant 0 : i32
    %c0_i32_0 = arith.constant 0 : i32
    %c0_i32_1 = arith.constant 0 : i32
    return %c0_i32, %c0_i32_0 : i32, i32
  }
  func.func @transform_12(%arg0: i32) -> (i32, i32) {
    %c0_i32 = arith.constant 0 : i32
    %c0_i32_0 = arith.constant 0 : i32
    %c0_i32_1 = arith.constant 0 : i32
    return %c0_i32, %c0_i32_0 : i32, i32
  }
  func.func @transform_13(%arg0: i32) -> (i32, i32) {
    %c0_i32 = arith.constant 0 : i32
    %c0_i32_0 = arith.constant 0 : i32
    %c0_i32_1 = arith.constant 0 : i32
    return %c0_i32, %c0_i32_0 : i32, i32
  }
  func.func @transform_14(%arg0: i32) -> (i32, i32) {
    %c0_i32 = arith.constant 0 : i32
    %c0_i32_0 = arith.constant 0 : i32
    %c0_i32_1 = arith.constant 0 : i32
    return %c0_i32, %c0_i32_0 : i32, i32
  }
  func.func @transform_15(%arg0: i32) -> (i32, i32) {
    %c0_i32 = arith.constant 0 : i32
    %c0_i32_0 = arith.constant 0 : i32
    %c0_i32_1 = arith.constant 0 : i32
    return %c0_i32, %c0_i32_0 : i32, i32
  }
  func.func @transform_16(%arg0: i32) -> (i32, i32) {
    %c0_i32 = arith.constant 0 : i32
    %c0_i32_0 = arith.constant 0 : i32
    %c0_i32_1 = arith.constant 0 : i32
    return %c0_i32, %c0_i32_0 : i32, i32
  }
  func.func @transform_17(%arg0: i32) -> (i32, i32) {
    %c0_i32 = arith.constant 0 : i32
    %c0_i32_0 = arith.constant 0 : i32
    %c0_i32_1 = arith.constant 0 : i32
    return %c0_i32, %c0_i32_0 : i32, i32
  }
  func.func @transform_18(%arg0: i32) -> (i32, i32, i32) {
    %c0_i32 = arith.constant 0 : i32
    %c0_i32_0 = arith.constant 0 : i32
    %c0_i32_1 = arith.constant 0 : i32
    return %arg0, %c0_i32, %c0_i32_0 : i32, i32, i32
  }
}

</mosaic_0001>

<bundles_post_ra>
// kernel: tpu_custom_call.1
= control target key start
LH: loop header
LB: loop body
LE: loop exit
PB: predicated region body
PF: predicated region fallthrough
CT: control target
= control target key end

     0   :  { %s3732_s0 = inlined_call_operand.vmem [shape: f32[2,8,32], index: 0, kind: input, shape index: {}]   ;;  %s3733_s1 = inlined_call_operand.vmem [shape: f32[2,8,32], index: 1, kind: input, shape index: {}]   ;;  %s3734_s2 = inlined_call_operand.vmem [shape: f32[2,8,32], index: 2, kind: input, shape index: {}]   ;;  %s3735_s3 = inlined_call_operand.hbm [shape: f32[2,8,8], index: 3, kind: input, shape index: {}]   ;;  %s3736_s4 = inlined_call_operand.hbm [shape: f32[2,8,8], index: 4, kind: input, shape index: {}]   ;;  %s3737_s5 = inlined_call_operand.hbm [shape: bf16[32,96], index: 5, kind: input, shape index: {}]   ;;  %s3738_s6 = inlined_call_operand.hbm [shape: bf16[32,32], index: 6, kind: input, shape index: {}]   ;;  %s3739_s7 = inlined_call_operand.vmem [shape: f32[1,32], index: 7, kind: input, shape index: {}]   ;;  %s3740_s8 = inlined_call_operand.vmem [shape: f32[1,32], index: 8, kind: input, shape index: {}]   ;;  %s3741_s9 = inlined_call_operand.hbm [shape: f32[1,32], index: 9, kind: input, shape index: {}]   ;;  %s3742_s10 = inlined_call_operand.vmem [shape: f32[1,32], index: 10, kind: input, shape index: {}]   ;;  %s3743_s11 = inlined_call_operand.vmem [shape: f32[1,32], index: 11, kind: input, shape index: {}]   ;;  %s3744_s12 = inlined_call_operand.vmem [shape: f32[1,32], index: 12, kind: input, shape index: {}]   ;;  %s3745_s13 = inlined_call_operand.vmem [shape: f32[1,32], index: 13, kind: input, shape index: {}]   ;;  %s3746_s14 = inlined_call_operand.vmem [shape: bf16[32,64], index: 14, kind: input, shape index: {}]   ;;  %s3747_s15 = inlined_call_operand.vmem [shape: f32[1,64], index: 15, kind: input, shape index: {}]   ;;  %s3748_s16 = inlined_call_operand.vmem [shape: bf16[64,32], index: 16, kind: input, shape index: {}]   ;;  %s3749_s17 = inlined_call_operand.vmem [shape: f32[1,32], index: 17, kind: input, shape index: {}]   ;;  %s3750_s18 = inlined_call_operand.hbm [shape: f32[2,8,32], index: 18, kind: output, shape index: {}]  }
   0x1   :  { %3758 = sst [smem:[#allocation19_spill]] %s3732_s0 }
   0x2   :  { %3759 = sst [smem:[#allocation20_spill]] %s3733_s1 }
   0x3   :  { %3760 = sst [smem:[#allocation21_spill]] %s3734_s2 }
   0x4   :  { %3761 = sst [smem:[#allocation22_spill]] %s3737_s5 }
   0x5   :  { %3762 = sst [smem:[#allocation23_spill]] %s3738_s6 }
   0x6   :  { %3763 = sst [smem:[#allocation24_spill]] %s3741_s9 }
   0x7   :  { %3764 = sst [smem:[#allocation25_spill]] %s3742_s10 }
   0x8   :  { %3765 = sst [smem:[#allocation26_spill]] %s3743_s11 }
   0x9   :  { %3766 = sst [smem:[#allocation27_spill]] %s3744_s12 }
   0xa   :  { %3767 = sst [smem:[#allocation28_spill]] %s3745_s13 }
   0xb   :  { %3768 = sst [smem:[#allocation29_spill]] %s3747_s15 }
   0xc   :  { %3769 = sst [smem:[#allocation30_spill]] %s3749_s17 }
   0xd   :  { %3770 = sst [smem:[#allocation31_spill]] %s3750_s18 }
   0xe   :  { %23 = vsyncpa [#allocation3], 0 }
   0xf   :  { %25 = vsyncpa [#allocation3 + $0x1], 0 }
  0x10   :  { %26 = vsyncpa [#allocation6], 0 }
  0x11   :  { %28 = vsyncpa [#allocation6 + $0x1], 0 }
  0x12   :  { %29 = vsyncpa [#allocation9], 0 }
  0x13   :  { %30 = vsyncpa [#allocation4], 0 }
  0x14   :  { %32 = vsyncpa [#allocation4 + $0x1], 0  ;;  %s3139_s27 = smov 0   ;;  %s3141_s28 = smov 0  }
  0x15   :  { %s3143_s29 = smov 0   ;;  %s3145_s30 = smov 0  }
  0x16 LB: > { %3771 = sst [smem:[#allocation17_spill]] %s3012_s27  ;;  %s3160_s0 = sadd.s32 4294967295, %s3024_s30   ;;  %s3024_s30 = sphi %s3145_s30, %s3808_s30   ;;  %s3020_s29 = sphi %s3143_s29, %s3807_s29   ;;  %s3016_s28 = sphi %s3141_s28, %s3806_s28   ;;  %s3012_s27 = sphi %s3139_s27, %s3805_s27  }
  0x17   : > { %s2371_s19 = sadd.s32 4294967294, %s3024_s30   ;;  %p136_p0 = scmp.ne.s32.totalorder %s3016_s28, %s3012_s27 }
  0x18   : > { %p3754_p1 = scmp.eq.s32.totalorder %s3160_s0, 0  ;;  %p465_p3 = scmp.eq.s32.totalorder %s2371_s19, 1 }
  0x19   : > { %p2372_p5 = scmp.ge.s32.totalorder %s3024_s30, 1  ;;  %p472_p7 = scmp.lt.s32.totalorder %s3024_s30, 3 }
  0x1a   : > { %p3169_p4 = por %p3754_p1, %p136_p0  ;;  %p3174_p6 = por %p465_p3, %p136_p0 }
  0x1b   : > { %p3179_p8 = pnand %p2372_p5, %p472_p7  ;;  %s3026_s22 = smov [#allocation7]  }
  0x1c   : > { %s3772_s1 = scalar_select %p3169_p4, 1, 0 }
  0x1d   : > { %s3773_s20 = scalar_select %p3174_p6, 1, 0 }
  0x1e   : > { %s3775_s21 = scalar_select %p3179_p8, 1, 0 }
  0x1f   : > { %3774 = sst [smem:[#allocation18_spill]] %s3773_s20  ;;  %s484_s2 = sshll.u32 %s3026_s22, 4  ;;  %s3183_s2 = int_to_ptr.vmem [resolvable:$true] %s484_s2 }
  0x20   : > { %p2678_p9 = pneg %p3179_p8  ;;  %s3027_s24 = smov [#allocation8]  }
  0x21   : > { %s497_s25 = sshll.u32 %s3027_s24, 4  ;;  %s3028_s26 = smov [#allocation10]   ;;  %s3194_s25 = int_to_ptr.vmem [resolvable:$true] %s497_s25 }
  0x22   : > { %p3190_p11 = pnand %p2678_p9, %p3754_p1  ;;  %s3196_s19 = sshll.u32 %s3028_s26, 4  ;;  %s518_s19 = int_to_ptr.vmem [resolvable:$true] %s3196_s19 }
  0x23   : > { %s3777_s5 = sld [smem:[#allocation22_spill]] }
  0x24   : > { %p3206_p13 = pneg %p3190_p11 }
  0x29   : > { %s2802_s27 = scalar_lea.hbm %s3777_s5, 256 }
  0x2a   : > { %p2803_p12 = scmp.ne.s32.totalorder %s3777_s5, %s2802_s27  ;;  %p2809_p5 = scmp.lt.u32.totalorder %s2802_s27, %s3777_s5 }
  0x2c   : > { %p2805_p0 = pnand %p3206_p13, %p2803_p12 }
  0x2e   : > { %p2806_p3 = pneg %p2805_p0 }
  0x30   : > { %p2811_p7 = pnand %p2809_p5, %p2806_p3 }
  0x32   : > { %2814 = shalt.err (!%p2811_p7)
}
  0x33   : > { %s2815_s13 = scalar_lea.vmem %s3183_s2, 256  ;;  %p2823_p2 = scmp.lt.s32.totalorder %s3183_s2, %s3183_s2 }
  0x34   : > { %p2816_p9 = scmp.ne.s32.totalorder %s3183_s2, %s2815_s13  ;;  %p2824_p6 = scmp.lt.s32.totalorder %s2815_s13, %s2815_s13 }
  0x36   : > { %p2818_p10 = pnand %p2816_p9, %p3206_p13  ;;  %p2825_p12 = por %p2824_p6, %p2823_p2 }
  0x38   : > { %p2819_p1 = pneg %p2818_p10 }
  0x3a   : > { %p2826_p0 = pnand %p2825_p12, %p2819_p1 }
  0x3c   : > { %2829 = shalt.err (!%p2826_p0)
}
  0x3d   : > { %s3029_s18 = smov 64   ;;  %s3030_s27 = smov 4  }
  0x3e   : > { %2681 = dma.hbm_to_vmem [thread:$0]  (!%p3190_p11), %s3777_s5, 256, %s3183_s2, [#allocation6], %s3029_s18, %s3029_s18, %s3030_s27  }
  0x3f   : > { %s3779_s6 = sld [smem:[#allocation23_spill]] }
  0x45   : > { %s2830_s17 = scalar_lea.hbm %s3779_s6, 256 }
  0x46   : > { %p2831_p2 = scmp.ne.s32.totalorder %s3779_s6, %s2830_s17  ;;  %p2837_p10 = scmp.lt.u32.totalorder %s2830_s17, %s3779_s6 }
  0x48   : > { %p2833_p1 = pnand %p2831_p2, %p3206_p13 }
  0x4a   : > { %p2834_p6 = pneg %p2833_p1 }
  0x4c   : > { %p2839_p3 = pnand %p2837_p10, %p2834_p6 }
  0x4e   : > { %2842 = shalt.err (!%p2839_p3)
}
  0x4f   : > { %s2843_s2 = scalar_lea.vmem %s3194_s25, 256  ;;  %p2851_p12 = scmp.lt.s32.totalorder %s3194_s25, %s3194_s25 }
  0x50   : > { %p2844_p5 = scmp.ne.s32.totalorder %s3194_s25, %s2843_s2  ;;  %p2852_p0 = scmp.lt.s32.totalorder %s2843_s2, %s2843_s2 }
  0x52   : > { %p2846_p7 = pnand %p2844_p5, %p3206_p13  ;;  %p2853_p2 = por %p2852_p0, %p2851_p12 }
  0x54   : > { %p2847_p9 = pneg %p2846_p7 }
  0x56   : > { %p2854_p1 = pnand %p2853_p2, %p2847_p9 }
  0x58   : > { %2857 = shalt.err (!%p2854_p1)
}
  0x59   : > { %2684 = dma.hbm_to_vmem [thread:$0]  (!%p3190_p11), %s3779_s6, 256, %s3194_s25, [#allocation9], %s3029_s18, %s3029_s18, %s3030_s27  }
  0x5a   : > { %s3780_s9 = sld [smem:[#allocation24_spill]] }
  0x60   : > { %s2858_s20 = scalar_lea.hbm %s3780_s9, 16 }
  0x61   : > { %p2859_p6 = scmp.ne.s32.totalorder %s3780_s9, %s2858_s20  ;;  %p2865_p5 = scmp.lt.u32.totalorder %s2858_s20, %s3780_s9 }
  0x63   : > { %p2861_p10 = pnand %p2859_p6, %p3206_p13 }
  0x65   : > { %p2862_p3 = pneg %p2861_p10 }
  0x67   : > { %p2867_p7 = pnand %p2865_p5, %p2862_p3 }
  0x69   : > { %2870 = shalt.err (!%p2867_p7)
}
  0x6a   : > { %s2871_s2 = scalar_lea.vmem %s518_s19, 16  ;;  %s2878_s25 = scalar_lea.vmem %s518_s19, 32 }
  0x6b   : > { %p2872_p9 = scmp.ne.s32.totalorder %s518_s19, %s2871_s2  ;;  %p2879_p2 = scmp.lt.s32.totalorder %s518_s19, %s518_s19 }
  0x6c   : > { %p2880_p1 = scmp.lt.s32.totalorder %s2878_s25, %s2871_s2 }
  0x6d   : > { %p2874_p12 = pnand %p2872_p9, %p3206_p13 }
  0x6e   : > { %p2881_p4 = por %p2880_p1, %p2879_p2 }
  0x6f   : > { %p2875_p0 = pneg %p2874_p12 }
  0x71   : > { %p2882_p8 = pnand %p2881_p4, %p2875_p0 }
  0x73   : > { %2885 = shalt.err (!%p2882_p8)
}
  0x74   : > { %2687 = dma.hbm_to_vmem [thread:$0]  (!%p3190_p11), %s3780_s9, 16, %s518_s19, [#allocation9]  }
  0x75   : > { %s3270_s12 = sadd.s32 1, %s3024_s30   ;;  %s123_s23 = sadd.s32 1, %s3020_s29 }
  0x76   : > { %s120_s10 = ssub.s32 %s3024_s30, %s3270_s12  ;;  %p130_p8 = scmp.ne.s32.totalorder %s3020_s29, %s3016_s28 }
  0x77   : > { %p121_p4 = scmp.eq.s32.totalorder %s120_s10, 0  ;;  %p131_p13 = scmp.eq.s32.totalorder %s3024_s30, 0 }
  0x78   : > { %p2702_p6 = scmp.lt.s32.totalorder %s3024_s30, 2  ;;  %p3781_p3 = scmp.eq.s32.totalorder %s3160_s0, 1 }
  0x79   : > { %s3280_s11 = scalar_select %p121_p4, %s3020_s29, %s123_s23  }
  0x7a   : > { %p132_p10 = por %p131_p13, %p130_p8  ;;  %p3284_p5 = por %p3781_p3, %p130_p8 }
  0x7b   : > { %s573_s17 = sand.u32 1, %s3020_s29   ;;  %s2378_s20 = sshll.u32 %s3024_s30, 7 }
  0x7c   : > { %s3782_s15 = scalar_select %p3284_p5, 1, 0 }
  0x7d   : > { %s3290_s19 = sshll.u32 %s573_s17, 3  ;;  %s3295_s26 = scalar_lea.hbm %s3735_s3, %s2378_s20 }
  0x7e   : > { %s577_s13 = scalar_lea.vmem [#allocation2], %s3290_s19  ;;  %p3298_p11 = pnand %p2702_p6, %p132_p10 }
  0x7f   : > { %s584_s2 = sshll.u32 %s577_s13, 4  ;;  %s3307_s10 = scalar_lea.hbm %s3736_s4, %s2378_s20  ;;  %s3302_s2 = int_to_ptr.vmem [resolvable:$true] %s584_s2 }
  0x80   : > { %s574_s23 = scalar_lea.sflag [#allocation3], %s573_s17  ;;  %s2886_s22 = scalar_lea.hbm %s3295_s26, 128 }
  0x81   : > { %p2887_p7 = scmp.ne.s32.totalorder %s3295_s26, %s2886_s22  ;;  %p2888_p9 = pneg %p3298_p11 }
  0x82   : > { %s2891_s5 = scalar_lea.hbm %s3735_s3, 256  ;;  %p2892_p2 = scmp.lt.u32.totalorder %s3295_s26, %s3735_s3 }
  0x83   : > { %p2889_p12 = pnand %p2888_p9, %p2887_p7  ;;  %p2893_p1 = scmp.lt.u32.totalorder %s2891_s5, %s2886_s22 }
  0x84   : > { %p2895_p8 = scmp.lt.u32.totalorder %s2886_s22, %s3295_s26 }
  0x85   : > { %p2890_p0 = pneg %p2889_p12  ;;  %p2894_p4 = por %p2893_p1, %p2892_p2 }
  0x87   : > { %p2896_p13 = por %p2895_p8, %p2894_p4 }
  0x89   : > { %p2897_p6 = pnand %p2896_p13, %p2890_p0 }
  0x8b   : > { %2900 = shalt.err (!%p2897_p6)
}
  0x8c   : > { %s2901_s17 = scalar_lea.vmem %s3302_s2, 128  ;;  %s3031_s20 = smov [#allocation2]  }
  0x8d   : > { %p2902_p10 = scmp.ne.s32.totalorder %s3302_s2, %s2901_s17  ;;  %s2906_s18 = sshll.u32 %s3031_s20, 4  ;;  %s2907_s18 = int_to_ptr.vmem [resolvable:$false] %s2906_s18 }
  0x8e   : > { %s2908_s6 = scalar_lea.vmem %s2907_s18, 256  ;;  %p2909_p12 = scmp.lt.s32.totalorder %s3302_s2, %s2907_s18 }
  0x8f   : > { %p2904_p3 = pnand %p2902_p10, %p2888_p9  ;;  %p2910_p2 = scmp.lt.s32.totalorder %s2908_s6, %s2901_s17 }
  0x91   : > { %p2905_p7 = pneg %p2904_p3  ;;  %p2911_p1 = por %p2910_p2, %p2909_p12 }
  0x93   : > { %p2912_p4 = pnand %p2911_p1, %p2905_p7 }
  0x95   : > { %2915 = shalt.err (!%p2912_p4)
}
  0x96   : > { %2691 = dma.hbm_to_vmem [thread:$0]  (!%p3298_p11), %s3295_s26, 128, %s3302_s2, %s574_s23  }
  0x97   : > { %s591_s5 = sand.u32 1, %s3024_s30   ;;  %s595_s9 = scalar_lea.vmem [#allocation5], %s3290_s19 }
  0x98   : > { %s602_s27 = sshll.u32 %s595_s9, 4  ;;  %s592_s22 = scalar_lea.sflag [#allocation6], %s591_s5  ;;  %s603_s27 = int_to_ptr.vmem [resolvable:$true] %s602_s27 }
  0x99   : > { %s2916_s24 = scalar_lea.hbm %s3307_s10, 128  ;;  %s2921_s20 = scalar_lea.hbm %s3736_s4, 256 }
  0x9a   : > { %p2917_p0 = scmp.ne.s32.totalorder %s3307_s10, %s2916_s24  ;;  %p2922_p6 = scmp.lt.u32.totalorder %s3307_s10, %s3736_s4 }
  0x9b   : > { %p2923_p10 = scmp.lt.u32.totalorder %s2921_s20, %s2916_s24  ;;  %p2925_p7 = scmp.lt.u32.totalorder %s2916_s24, %s3307_s10 }
  0x9c   : > { %p2919_p8 = pnand %p2917_p0, %p2888_p9 }
  0x9d   : > { %p2924_p3 = por %p2923_p10, %p2922_p6 }
  0x9e   : > { %p2920_p13 = pneg %p2919_p8 }
  0x9f   : > { %p2926_p12 = por %p2925_p7, %p2924_p3 }
  0xa1   : > { %p2927_p2 = pnand %p2926_p12, %p2920_p13 }
  0xa3   : > { %2930 = shalt.err (!%p2927_p2)
}
  0xa4   : > { %s2931_s19 = scalar_lea.vmem %s603_s27, 128  ;;  %s3032_s26 = smov [#allocation5]  }
  0xa5   : > { %p2932_p1 = scmp.ne.s32.totalorder %s603_s27, %s2931_s19  ;;  %s2936_s2 = sshll.u32 %s3032_s26, 4  ;;  %s2937_s2 = int_to_ptr.vmem [resolvable:$false] %s2936_s2 }
  0xa6   : > { %s2938_s23 = scalar_lea.vmem %s2937_s2, 256  ;;  %p2939_p8 = scmp.lt.s32.totalorder %s603_s27, %s2937_s2 }
  0xa7   : > { %p2934_p4 = pnand %p2932_p1, %p2888_p9  ;;  %p2940_p5 = scmp.lt.s32.totalorder %s2938_s23, %s2931_s19 }
  0xa9   : > { %p2935_p0 = pneg %p2934_p4  ;;  %p2941_p6 = por %p2940_p5, %p2939_p8 }
  0xab   : > { %p2942_p10 = pnand %p2941_p6, %p2935_p0 }
  0xad   : > { %2945 = shalt.err (!%p2942_p10)
}
  0xae   : > { %2694 = dma.hbm_to_vmem [thread:$0]  (!%p3298_p11), %s3307_s10, 128, %s603_s27, %s592_s22  }
  0xaf   : > { %p3784_p13 = scmp.ne.s32.totalorder %s3775_s21, 0 }
  0xb0   : > { %s3358_s5 = sand.u32 (!%p3784_p13), 1, %s3016_s28   ;;  %p3785_p5 = scmp.ne.s32.totalorder (!%p3784_p13), %s3772_s1, 0 }
  0xb1   : > { %611 = sbr.rel (%p3784_p13) target bundleno = 4224 (0x1080), region = 92  ;;  %s3361_s9 = sshll.u32 (!%p3784_p13), %s3358_s5, 3 }
  0xb2   : > { %s614_s24 = scalar_lea.sflag (!%p3784_p13), [#allocation3], %s3358_s5  ;;  %s617_s13 = scalar_lea.vmem (!%p3784_p13), [#allocation2], %s3361_s9 }
  0xb8   : > { %2991 = dma.done.wait (%p3785_p5), %s614_s24, 128  }
  0xb9   : > { %2993 = vsyncadd (%p3785_p5), %s614_s24, 4294967168  ;;  %s622_s21 = sand.u32 1, %s3160_s0   ;;  %s626_s10 = scalar_lea.vmem [#allocation5], %s3361_s9 }
  0xba   : > { %s623_s25 = scalar_lea.sflag [#allocation6], %s622_s21 }
  0xbb   : > { %2995 = dma.done.wait (%p3785_p5), %s623_s25, 128  }
  0xbc   : > { %2997 = vsyncadd (%p3785_p5), %s623_s25, 4294967168  ;;  %p3786_p11 = scmp.eq.s32.totalorder %s3160_s0, 0 }
  0xbe   : > { %2999 = dma.done.wait (%p3786_p11), [#allocation6], 256   ;;  %p3787_p9 = pmov %p3786_p11 }
  0xc0   : > { %3001 = vsyncadd (%p3787_p9), [#allocation6], 4294967040  ;;  %p3788_p3 = pmov %p3787_p9 }
  0xc2   : > { %3003 = dma.done.wait (%p3788_p3), [#allocation9], 272   ;;  %p3789_p7 = pmov %p3788_p3 }
  0xc3   : > { %p708_p12 = scmp.lt.s32.totalorder %s3160_s0, 1  ;;  %v3033_v0 = vmov 0.0   ;;  %vm3034_vm0 = vmmov 0   ;;  %s3790_s20 = sld [smem:[#allocation19_spill]]  ;;  %v3397_v1 = vld [vmem:[#allocation7] sm:$0xff]   ;;  %v3399_v2 = vld [vmem:[#allocation7 + $0x8] sm:$0xff]  }
  0xc4   : > { %3005 = vsyncadd (%p3789_p7), [#allocation9], 4294967024  ;;  %2496 = vmatprep.subr.bf16.mxu0 %v3033_v0  ;;  %2500 = vmatprep.mubr.msk.bf16.mxu0 %vm3034_vm0, %v3033_v0  ;;  %vm748_vm1 = vcmask 261120   ;;  %s3035_s6 = smov 104   ;;  %s3036_s19 = smov 120   ;;  %vm802_vm2 = vcmask 64512  }
  0xc5   : > { %s709_s1 = scalar_select %p708_p12, %s3160_s0, 1  ;;  %2504 = vmatprep.subr.bf16.mxu1 %v3033_v0  ;;  %2506 = vmatprep.mubr.msk.bf16.mxu1 %vm3034_vm0, %v3033_v0  ;;  %v725_v21 = vld [vmem:[%s626_s10] sm:$0xff]  ;;  %vm1046_vm3 = vcmask 1043456   ;;  %vm1247_vm4 = vcmask 130048   ;;  %vm1249_vm5 = vcmask 195584   ;;  %vm2125_vm6 = vcmask 523264  }
  0xc6   : > { %2497 = vmatpush3.bf16.msra.mxu0 %v3397_v1  ;;  %s3037_s26 = smov 96   ;;  %s3038_s2 = smov 112  }
  0xc7   : > { %s3391_s27 = sshll.u32 %s709_s1, 3  ;;  %2498 = vmatprep.subr.bf16.mxu0 %v3033_v0  ;;  %s3039_s23 = smov 64  }
  0xc8   : > { %s3040_s24 = smov 8   ;;  %s3041_s21 = smov 16  }
  0xc9   : > { %s711_s18 = scalar_lea.vmem %s3790_s20, %s3391_s27  ;;  %s3791_s1 = sld [smem:[#allocation20_spill]] }
  0xca   : > { %v3402_v3 = vld [vmem:[%s711_s18] sm:$0xff]  ;;  %2499 = vmatpush3.bf16.msra.mxu0 %v3399_v2  ;;  %s3042_s17 = smov 24   ;;  %s3792_s25 = sld [smem:[#allocation21_spill]] }
  0xcb   : > { %v735_v4 = vpack.c.bf16 %v3402_v3, %v3402_v3  ;;  %2510 = vmatprep.subr.bf16.mxu0 %v3033_v0  ;;  %p3800_p1 = scmp.ne.s32.totalorder %s3782_s15, 0 }
  0xcd   : > { %2501 = vmatmul.mubr.msk.bf16.vlgmr.msra.gmra.mrb[0].mxu0 %vm748_vm1, %v735_v4 }
  0xce   : > { %2512 = vmatprep.mubr.msk.bf16.mxu0 %vm3034_vm0, %v3033_v0 }
  0xcf   : > { %s715_s22 = scalar_lea.vmem %s3791_s1, %s3391_s27  ;;  %s2201_s1 = scalar_lea.sflag [#allocation4], %s3358_s5 }
  0xd0   : > { %s719_s10 = scalar_lea.vmem %s3792_s25, %s3391_s27  ;;  %s3793_s25 = sld [smem:[#allocation25_spill]] }
 0x1a0   : > { %v786_v5 = vpop.f32.mrb[0].mxu0 }
 0x1a1   : > { %v3412_v6 = vpack.c.bf16 %v786_v5, %v786_v5  ;;  %v2502_v7 = vpop.f32.mrb[1].mxu0 }
 0x1a2   : > { %v789_v8 = vpop.f32.mrb[2].mxu0 }
 0x1a3   : > { %798 = vrot.lane.b32.xlu1 %v3412_v6, %s3035_s6  ;;  %794 = vrot.lane.b32.xlu0 %v3412_v6, %s3036_s19  ;;  %v2503_v9 = vpop.f32.mrb[3].mxu0 }
 0x1a7   : > { %800 = vrot.lane.b32.xlu1 %v3412_v6, %s3037_s26  ;;  %796 = vrot.lane.b32.xlu0 %v3412_v6, %s3038_s2 }
 0x215   : > { %v3422_v10 = vpop.permute.xlu1 %798  ;;  %v795_v11 = vpop.permute.xlu0 %794 }
 0x216   : > { %849 = vrot.lane.b32.xlu0 %v795_v11, %s3037_s26 }
 0x219   : > { %v801_v12 = vpop.permute.xlu1 %800  ;;  %v3425_v13 = vpop.permute.xlu0 %796 }
 0x21a   : > { %945 = vrot.lane.b32.xlu0 %v3422_v10, %s3037_s26  ;;  %897 = vrot.lane.b32.xlu1 %v3425_v13, %s3037_s26  ;;  %v807_v14 = vsel %vm802_vm2, %v801_v12, 0 }
 0x21b   : > { %2505 = vmatpush3.bf16.xpose.msra.mxu1 %v807_v14 }
 0x21c   : > { %2516 = vmatprep.subr.bf16.mxu1 %v3033_v0 }
 0x222   : > { %2507 = vmatmul.mubr.msk.bf16.vlgmr.msra.gmra.mrb[0].mxu1 %vm802_vm2, %v3412_v6 }
 0x223   : > { %2518 = vmatprep.mubr.msk.bf16.mxu1 %vm3034_vm0, %v3033_v0 }
 0x288   : > { %v850_v15 = vpop.permute.xlu0 %849 }
 0x289   : > { %v855_v16 = vsel %vm802_vm2, %v850_v15, 0 }
 0x28a   : > { %2511 = vmatpush3.bf16.xpose.msra.mxu0 %v855_v16 }
 0x28b   : > { %2522 = vmatprep.subr.bf16.mxu0 %v3033_v0 }
 0x28c   : > { %v898_v17 = vpop.permute.xlu1 %897  ;;  %v946_v19 = vpop.permute.xlu0 %945 }
 0x28d   : > { %v903_v18 = vsel %vm802_vm2, %v898_v17, 0  ;;  %v951_v20 = vsel %vm802_vm2, %v946_v19, 0 }
 0x28e   : > { %2517 = vmatpush3.bf16.xpose.msra.mxu1 %v903_v18 }
 0x28f   : > { %2528 = vmatprep.subr.bf16.mxu1 %v3033_v0 }
 0x291   : > { %2513 = vmatmul.mubr.msk.bf16.vlgmr.msra.gmra.mrb[4].mxu0 %vm802_vm2, %v795_v11 }
 0x292   : > { %2523 = vmatpush3.bf16.xpose.msra.mxu0 %v951_v20  ;;  %2524 = vmatprep.mubr.msk.bf16.mxu0 %vm3034_vm0, %v3033_v0 }
 0x293   : > { %2534 = vmatprep.subr.bf16.mxu0 %v3033_v0 }
 0x295   : > { %2519 = vmatmul.mubr.msk.bf16.vlgmr.msra.gmra.mrb[4].mxu1 %vm802_vm2, %v3425_v13 }
 0x296   : > { %2530 = vmatprep.mubr.msk.bf16.mxu1 %vm3034_vm0, %v3033_v0 }
 0x299   : > { %2525 = vmatmul.mubr.msk.bf16.vlgmr.msra.gmra.mrb[8].mxu0 %vm802_vm2, %v3422_v10 }
 0x29a   : > { %2536 = vmatprep.mubr.msk.bf16.mxu0 %vm3034_vm0, %v3033_v0 }
 0x2f5   : > { %v843_v22 = vpop.f32.mrb[0].mxu1 }
 0x2f6   : > { %v844_v23 = vadd.f32 %v843_v22, %v725_v21  ;;  %v2508_v24 = vpop.f32.mrb[1].mxu1 }
 0x2f7   : > { %v846_v25 = vpop.f32.mrb[2].mxu1 }
 0x2f8   : > { %v2509_v26 = vpop.f32.mrb[3].mxu1  ;;  %v993_v27 = vsel %vm802_vm2, %v844_v23, -inf }
 0x2f9   : > { %994 = vmax.xlane.f32.xlu1 %v993_v27 }
 0x364   : > { %v891_v28 = vpop.f32.mrb[4].mxu0 }
 0x365   : > { %v892_v29 = vadd.f32 %v891_v28, %v725_v21  ;;  %v2514_v30 = vpop.f32.mrb[5].mxu0 }
 0x366   : > { %v894_v31 = vpop.f32.mrb[6].mxu0 }
 0x367   : > { %v2515_v32 = vpop.f32.mrb[7].mxu0  ;;  %v996_v33 = vsel %vm802_vm2, %v892_v29, -inf }
 0x368   : > { %v939_v34 = vpop.f32.mrb[4].mxu1  ;;  %997 = vmax.xlane.f32.xlu0 %v996_v33 }
 0x369   : > { %v940_v35 = vadd.f32 %v939_v34, %v725_v21  ;;  %v2520_v36 = vpop.f32.mrb[5].mxu1  ;;  %v3495_v34 = vld [vmem:[#allocation8] sm:$0xff]  }
 0x36a   : > { %v942_v37 = vpop.f32.mrb[6].mxu1 }
 0x36b   : > { %v2521_v38 = vpop.f32.mrb[7].mxu1  ;;  %v999_v39 = vsel %vm802_vm2, %v940_v35, -inf }
 0x36c   : > { %1000 = vmax.xlane.f32.xlu0 %v999_v39  ;;  %v987_v40 = vpop.f32.mrb[8].mxu0 }
 0x36d   : > { %v988_v41 = vadd.f32 %v987_v40, %v725_v21  ;;  %v2526_v42 = vpop.f32.mrb[9].mxu0 }
 0x36e   : > { %v990_v43 = vpop.f32.mrb[10].mxu0 }
 0x36f   : > { %v2527_v44 = vpop.f32.mrb[11].mxu0  ;;  %v1002_v45 = vsel %vm802_vm2, %v988_v41, -inf }
 0x370   : > { %1003 = vmax.xlane.f32.xlu1 %v1002_v45  ;;  %v722_v45 = vld [vmem:[%s715_s22] sm:$0xff] }
 0x381   : > { %1090 = vrot.lane.b32.xlu1 %v795_v11, %s3039_s23 }
 0x382   : > { %1041 = vrot.lane.b32.xlu0 %v3412_v6, %s3039_s23 }
 0x386   : > { %v995_v46 = vpop.xlane.xlu1 %994 }
 0x387   : > { %v1005_v47 = vsub.f32 %v844_v23, %v995_v46 }
 0x389   : > { %v1009_v48 = vmul.f32 1.442695, %v1005_v47  ;;  %v1344_v47 = vpack.c.bf16 %v722_v45, %v722_v45 }
 0x38b   : > { %2764 = vpow2.f32 %v1009_v48 }
 0x395   : > { %v2765_v49 = vpop.eup %2764 }
 0x396   : > { %v1017_v50 = vsel %vm802_vm2, %v2765_v49, 0.0 }
 0x3a1   : > { %1018 = vadd.xlane.f32.xlu0 %v1017_v50 }
 0x3f5   : > { %v998_v51 = vpop.xlane.xlu0 %997 }
 0x3f6   : > { %v1006_v52 = vsub.f32 %v892_v29, %v998_v51 }
 0x3f8   : > { %v1011_v53 = vmul.f32 1.442695, %v1006_v52 }
 0x3f9   : > { %v1001_v54 = vpop.xlane.xlu0 %1000 }
 0x3fa   : > { %2766 = vpow2.f32 %v1011_v53  ;;  %v1007_v55 = vsub.f32 %v940_v35, %v1001_v54  ;;  %v3499_v35 = vld [vmem:[#allocation8 + $0x8] sm:$0xff]  }
 0x3fc   : > { %v1013_v56 = vmul.f32 1.442695, %v1007_v55 }
 0x3fd   : > { %v1042_v57 = vpop.permute.xlu0 %1041  ;;  %v1004_v58 = vpop.xlane.xlu1 %1003 }
 0x3fe   : > { %2768 = vpow2.f32 %v1013_v56  ;;  %v1048_v59 = vsel %vm1046_vm3, %v1042_v57, 0  ;;  %v1008_v60 = vsub.f32 %v988_v41, %v1004_v58  ;;  %v723_v58 = vld [vmem:[%s719_s10] sm:$0xff] }
 0x3ff   : > { %2529 = vmatpush3.bf16.msra.mxu1 %v1048_v59 }
 0x400   : > { %v1015_v61 = vmul.f32 1.442695, %v1008_v60  ;;  %2540 = vmatprep.subr.bf16.mxu1 %v3033_v0  ;;  %v1388_v60 = vpack.c.bf16 %v723_v58, %v723_v58 }
 0x401   : > { %v1091_v62 = vpop.permute.xlu1 %1090 }
 0x402   : > { %2770 = vpow2.f32 %v1015_v61  ;;  %v1096_v63 = vsel %vm1046_vm3, %v1091_v62, 0 }
 0x403   : > { %2535 = vmatpush3.bf16.msra.mxu0 %v1096_v63 }
 0x404   : > { %v2767_v4 = vpop.eup %2766  ;;  %2546 = vmatprep.subr.bf16.mxu0 %v3033_v0 }
 0x405   : > { %v1020_v5 = vsel %vm802_vm2, %v2767_v4, 0.0 }
 0x406   : > { %1021 = vadd.xlane.f32.xlu1 %v1020_v5  ;;  %v3535_v5 = vld [vmem:[%s3739_s7] ss:$0 sm:$0xff] }
 0x408   : > { %v2769_v6 = vpop.eup %2768 }
 0x409   : > { %v1023_v7 = vsel %vm802_vm2, %v2769_v6, 0.0 }
 0x40a   : > { %1024 = vadd.xlane.f32.xlu0 %v1023_v7 }
 0x40c   : > { %v2771_v8 = vpop.eup %2770 }
 0x40d   : > { %v1026_v9 = vsel %vm802_vm2, %v2771_v8, 0.0 }
 0x40e   : > { %1027 = vadd.xlane.f32.xlu1 %v1026_v9 }
 0x41f   : > { %1138 = vrot.lane.b32.xlu1 %v3425_v13, %s3039_s23 }
 0x420   : > { %1186 = vrot.lane.b32.xlu0 %v3422_v10, %s3039_s23 }
 0x42e   : > { %v1019_v11 = vpop.xlane.xlu0 %1018 }
 0x42f   : > { %2772 = vrcp.f32 %v1019_v11 }
 0x439   : > { %v2773_v12 = vpop.eup %2772 }
 0x43a   : > { %v1033_v14 = vmul.f32 %v2773_v12, %v2765_v49 }
 0x43c   : > { %v1037_v15 = vpack.c.bf16 %v1033_v14, %v1033_v14 }
 0x43e   : > { %2531 = vmatmul.mubr.msk.bf16.vlgmr.msra.gmra.mrb[8].mxu1 %vm802_vm2, %v1037_v15 }
 0x43f   : > { %2542 = vmatprep.mubr.msk.bf16.mxu1 %vm3034_vm0, %v3033_v0 }
 0x493   : > { %v1022_v16 = vpop.xlane.xlu1 %1021 }
 0x494   : > { %2774 = vrcp.f32 %v1022_v16 }
 0x497   : > { %v1025_v17 = vpop.xlane.xlu0 %1024 }
 0x498   : > { %2776 = vrcp.f32 %v1025_v17 }
 0x49b   : > { %v1028_v18 = vpop.xlane.xlu1 %1027  ;;  %v1187_v10 = vpop.permute.xlu0 %1186 }
 0x49c   : > { %2778 = vrcp.f32 %v1028_v18  ;;  %v1192_v25 = vsel %vm1046_vm3, %v1187_v10, 0 }
 0x49e   : > { %v2775_v13 = vpop.eup %2774 }
 0x49f   : > { %v1034_v19 = vmul.f32 %v2775_v13, %v2767_v4  ;;  %v1139_v20 = vpop.permute.xlu1 %1138 }
 0x4a0   : > { %v1144_v21 = vsel %vm1046_vm3, %v1139_v20, 0 }
 0x4a1   : > { %2541 = vmatpush3.bf16.msra.mxu1 %v1144_v21  ;;  %v1038_v22 = vpack.c.bf16 %v1034_v19, %v1034_v19 }
 0x4a2   : > { %v2777_v23 = vpop.eup %2776  ;;  %2552 = vmatprep.subr.bf16.mxu1 %v3033_v0 }
 0x4a3   : > { %v1035_v24 = vmul.f32 %v2777_v23, %v2769_v6  ;;  %2537 = vmatmul.mubr.msk.bf16.vlgmr.msra.gmra.mrb[12].mxu0 %vm802_vm2, %v1038_v22 }
 0x4a4   : > { %2547 = vmatpush3.bf16.msra.mxu0 %v1192_v25  ;;  %2548 = vmatprep.mubr.msk.bf16.mxu0 %vm3034_vm0, %v3033_v0 }
 0x4a5   : > { %v1039_v26 = vpack.c.bf16 %v1035_v24, %v1035_v24  ;;  %2560 = vmatprep.subr.bf16.mxu0 %v3033_v0 }
 0x4a6   : > { %v2779_v27 = vpop.eup %2778 }
 0x4a7   : > { %v1036_v28 = vmul.f32 %v2779_v27, %v2771_v8  ;;  %2543 = vmatmul.mubr.msk.bf16.vlgmr.msra.gmra.mrb[12].mxu1 %vm802_vm2, %v1039_v26 }
 0x4a8   : > { %2556 = vmatprep.mubr.msk.bf16.mxu1 %vm3034_vm0, %v3033_v0  ;;  %2553 = vmatpush3.bf16.msra.mxu1 %v3495_v34 }
 0x4a9   : > { %v1040_v29 = vpack.c.bf16 %v1036_v28, %v1036_v28  ;;  %2554 = vmatprep.subr.bf16.mxu1 %v3033_v0 }
 0x4ab   : > { %2549 = vmatmul.mubr.msk.bf16.vlgmr.msra.gmra.mrb[16].mxu0 %vm802_vm2, %v1040_v29 }
 0x4ac   : > { %2561 = vmatpush3.bf16.msra.mxu0 %v3397_v1  ;;  %2564 = vmatprep.mubr.msk.bf16.mxu0 %vm3034_vm0, %v3033_v0 }
 0x4ad   : > { %2562 = vmatprep.subr.bf16.mxu0 %v3033_v0  ;;  %2555 = vmatpush3.bf16.msra.mxu1 %v3499_v35 }
 0x4ae   : > { %2568 = vmatprep.subr.bf16.mxu1 %v3033_v0 }
 0x4b0   : > { %2563 = vmatpush3.bf16.msra.mxu0 %v3399_v2 }
 0x4b1   : > { %2576 = vmatprep.subr.bf16.mxu0 %v3033_v0 }
 0x4b3   : > { %2565 = vmatmul.mubr.msk.bf16.vlgmr.msra.gmra.mrb[20].mxu0 %vm748_vm1, %v1344_v47 }
 0x4b4   : > { %2580 = vmatprep.mubr.msk.bf16.mxu0 %vm3034_vm0, %v3033_v0 }
 0x511   : > { %v1084_v30 = vpop.f32.mrb[8].mxu1 }
 0x512   : > { %v2532_v31 = vpop.f32.mrb[9].mxu1 }
 0x513   : > { %v1087_v32 = vpop.f32.mrb[10].mxu1 }
 0x514   : > { %v2533_v33 = vpop.f32.mrb[11].mxu1 }
 0x576   : > { %v1132_v36 = vpop.f32.mrb[12].mxu0 }
 0x577   : > { %1235 = vrot.lane.b32.xlu1 %v1132_v36, %s3040_s24  ;;  %v2538_v37 = vpop.f32.mrb[13].mxu0 }
 0x578   : > { %v1135_v38 = vpop.f32.mrb[14].mxu0 }
 0x579   : > { %v2539_v39 = vpop.f32.mrb[15].mxu0 }
 0x57a   : > { %v1180_v40 = vpop.f32.mrb[12].mxu1 }
 0x57b   : > { %1239 = vrot.lane.b32.xlu0 %v1180_v40, %s3041_s21  ;;  %v2544_v41 = vpop.f32.mrb[13].mxu1 }
 0x57c   : > { %v1183_v42 = vpop.f32.mrb[14].mxu1 }
 0x57d   : > { %v2545_v43 = vpop.f32.mrb[15].mxu1  ;;  %v2406_v42 = vld [vmem:[%s3740_s8] ss:$0 sm:$0xff] }
 0x57e   : > { %v1228_v44 = vpop.f32.mrb[16].mxu0 }
 0x57f   : > { %1243 = vrot.lane.b32.xlu1 %v1228_v44, %s3042_s17  ;;  %v2550_v46 = vpop.f32.mrb[17].mxu0  ;;  %1389 = vrot.lane.b32.xlu0 %v3397_v1, %s3037_s26  ;;  %v2407_v44 = vld [vmem:[#allocation10] ss:$0 sm:$0xff] }
 0x580   : > { %v1231_v48 = vpop.f32.mrb[18].mxu0 }
 0x581   : > { %v2551_v49 = vpop.f32.mrb[19].mxu0 }
 0x583   : > { %1391 = vrot.lane.b32.xlu1 %v3399_v2, %s3037_s26  ;;  %s3794_s26 = sld [smem:[#allocation26_spill]] }
 0x586   : > { %v1382_v61 = vpop.f32.mrb[20].mxu0 }
 0x587   : > { %v2566_v62 = vpop.f32.mrb[21].mxu0  ;;  %v1488_v20 = vpack.c.bf16 %v1382_v61, %v1382_v61 }
 0x588   : > { %v1385_v63 = vpop.f32.mrb[22].mxu0 }
 0x589   : > { %v2567_v4 = vpop.f32.mrb[23].mxu0 }
 0x5e9   : > { %v1236_v50 = vpop.permute.xlu1 %1235 }
 0x5ea   : > { %v1246_v52 = vsel %vm802_vm2, %v1084_v30, %v1236_v50 }
 0x5ed   : > { %v1240_v51 = vpop.permute.xlu0 %1239 }
 0x5ee   : > { %v1248_v53 = vsel %vm1247_vm4, %v1246_v52, %v1240_v51 }
 0x5f1   : > { %v1244_v54 = vpop.permute.xlu1 %1243  ;;  %v1390_v57 = vpop.permute.xlu0 %1389 }
 0x5f2   : > { %v1250_v55 = vsel %vm1249_vm5, %v1248_v53, %v1244_v54 }
 0x5f3   : > { %v1251_v56 = vpack.c.bf16 %v1250_v55, %v1250_v55 }
 0x5f5   : > { %2557 = vmatmul.mubr.msk.bf16.vlgmr.msra.gmra.mrb[16].mxu1 %vm748_vm1, %v1251_v56  ;;  %v1392_v59 = vpop.permute.xlu1 %1391 }
 0x5f6   : > { %2569 = vmatpush3.bf16.msra.mxu1 %v1390_v57  ;;  %2572 = vmatprep.mubr.msk.bf16.mxu1 %vm3034_vm0, %v3033_v0 }
 0x5f7   : > { %2570 = vmatprep.subr.bf16.mxu1 %v3033_v0 }
 0x5fa   : > { %2571 = vmatpush3.bf16.msra.mxu1 %v1392_v59 }
 0x5fb   : > { %2584 = vmatprep.subr.bf16.mxu1 %v3033_v0 }
 0x5fd   : > { %2573 = vmatmul.mubr.msk.bf16.vlgmr.msra.gmra.mrb[20].mxu1 %vm748_vm1, %v1388_v60 }
 0x5fe   : > { %2586 = vmatprep.mubr.msk.bf16.mxu1 %vm3034_vm0, %v3033_v0 }
 0x6c8   : > { %v1307_v6 = vpop.f32.mrb[16].mxu1 }
 0x6c9   : > { %v1308_v7 = vadd.f32 %v3535_v5, %v1307_v6  ;;  %v2558_v8 = vpop.f32.mrb[17].mxu1 }
 0x6ca   : > { %v1310_v9 = vpop.f32.mrb[18].mxu1 }
 0x6cb   : > { %v2559_v11 = vpop.f32.mrb[19].mxu1  ;;  %v1313_v12 = vadd.f32 %v1308_v7, %v3402_v3 }
 0x6cd   : > { %v1316_v14 = vsel %vm748_vm1, %v1313_v12, 0.0 }
 0x6ce   : > { %1317 = vadd.xlane.f32.xlu0 %v1316_v14 }
 0x6d0   : > { %v1432_v15 = vpop.f32.mrb[20].mxu1 }
 0x6d1   : > { %v1496_v16 = vpack.c.bf16 %v1432_v15, %v1432_v15  ;;  %v2574_v17 = vpop.f32.mrb[21].mxu1 }
 0x6d2   : > { %v1435_v18 = vpop.f32.mrb[22].mxu1 }
 0x6d3   : > { %v1516_v13 = vsel %vm802_vm2, %v1496_v16, 0  ;;  %v2575_v19 = vpop.f32.mrb[23].mxu1 }
 0x6d4   : > { %2585 = vmatpush3.bf16.xpose.msra.mxu1 %v1516_v13 }
 0x6d5   : > { %2596 = vmatprep.subr.bf16.mxu1 %v3033_v0 }
 0x6db   : > { %2587 = vmatmul.mubr.msk.bf16.vlgmr.msra.gmra.mrb[24].mxu1 %vm802_vm2, %v1488_v20 }
 0x6dc   : > { %2598 = vmatprep.mubr.msk.bf16.mxu1 %vm3034_vm0, %v3033_v0 }
 0x6e4   : > { %1439 = vrot.lane.b32.xlu0 %v3397_v1, %s3039_s23  ;;  %v3559_v1 = vld [vmem:[%s617_s13] sm:$0xff]  ;;  %s2435_s13 = sshll.u32 %s3160_s0, 7  ;;  %s3043_s0 = smov [#allocation11]  }
 0x6e8   : > { %1498 = vrot.lane.b32.xlu0 %v1496_v16, %s3036_s19 }
 0x6ec   : > { %1490 = vrot.lane.b32.xlu0 %v1488_v20, %s3036_s19 }
 0x6f0   : > { %1492 = vrot.lane.b32.xlu0 %v1488_v20, %s3038_s2 }
 0x75b   : > { %v1318_v3 = vpop.xlane.xlu0 %1317 }
 0x75c   : > { %v1320_v10 = vmul.f32 0.03125, %v1318_v3 }
 0x75e   : > { %v1321_v21 = vsub.f32 %v1313_v12, %v1320_v10 }
 0x75f   : > { %v1440_v24 = vpop.permute.xlu0 %1439 }
 0x760   : > { %v1322_v22 = vmul.f32 %v1321_v21, %v1321_v21  ;;  %2577 = vmatpush3.bf16.msra.mxu0 %v1440_v24 }
 0x761   : > { %2578 = vmatprep.subr.bf16.mxu0 %v3033_v0 }
 0x762   : > { %v1323_v23 = vsel %vm748_vm1, %v1322_v22, 0.0 }
 0x763   : > { %1324 = vadd.xlane.f32.xlu1 %v1323_v23  ;;  %v1499_v32 = vpop.permute.xlu0 %1498 }
 0x764   : > { %v1562_v47 = vsel %vm802_vm2, %v1499_v32, 0 }
 0x767   : > { %v1491_v38 = vpop.permute.xlu0 %1490 }
 0x76b   : > { %v1493_v40 = vpop.permute.xlu0 %1492 }
 0x774   : > { %1441 = vrot.lane.b32.xlu1 %v3399_v2, %s3039_s23  ;;  %s707_s23 = scalar_lea.vmem [#allocation11], %s3361_s9  ;;  %s2950_s9 = sshll.u32 %s3043_s0, 4  ;;  %s2951_s9 = int_to_ptr.vmem [resolvable:$false] %s2950_s9 }
 0x778   : > { %1500 = vrot.lane.b32.xlu1 %v1496_v16, %s3038_s2 }
 0x77c   : > { %1502 = vrot.lane.b32.xlu1 %v1496_v16, %s3035_s6 }
 0x780   : > { %1494 = vrot.lane.b32.xlu1 %v1488_v20, %s3035_s6 }
 0x7ae   : > { %v1552_v25 = vpop.f32.mrb[24].mxu1 }
 0x7af   : > { %v1553_v26 = vadd.f32 %v1552_v25, %v3559_v1  ;;  %v2588_v27 = vpop.f32.mrb[25].mxu1 }
 0x7b0   : > { %v1555_v28 = vpop.f32.mrb[26].mxu1 }
 0x7b1   : > { %v1696_v2 = vsel %vm802_vm2, %v1553_v26, -inf  ;;  %v2589_v29 = vpop.f32.mrb[27].mxu1 }
 0x7b2   : > { %1697 = vmax.xlane.f32.xlu0 %v1696_v2 }
 0x7f0   : > { %v1325_v30 = vpop.xlane.xlu1 %1324 }
 0x7f1   : > { %v1326_v31 = vmul.f32 0.03125, %v1325_v30 }
 0x7f3   : > { %v1327_v33 = vadd.f32 1e-05, %v1326_v31 }
 0x7f4   : > { %v1442_v36 = vpop.permute.xlu1 %1441 }
 0x7f5   : > { %2780 = vrsqrt.f32 %v1327_v33  ;;  %2579 = vmatpush3.bf16.msra.mxu0 %v1442_v36 }
 0x7f6   : > { %2590 = vmatprep.subr.bf16.mxu0 %v3033_v0 }
 0x7f8   : > { %v1501_v37 = vpop.permute.xlu1 %1500 }
 0x7f9   : > { %v1608_v39 = vsel %vm802_vm2, %v1501_v37, 0 }
 0x7fa   : > { %2597 = vmatpush3.bf16.xpose.msra.mxu1 %v1608_v39 }
 0x7fb   : > { %2608 = vmatprep.subr.bf16.mxu1 %v3033_v0 }
 0x7fc   : > { %v1503_v49 = vpop.permute.xlu1 %1502 }
 0x7fd   : > { %v1654_v50 = vsel %vm802_vm2, %v1503_v49, 0 }
 0x7ff   : > { %v2781_v41 = vpop.eup %2780 }
 0x800   : > { %v1329_v43 = vmul.f32 %v2781_v41, %v1321_v21  ;;  %v1495_v51 = vpop.permute.xlu1 %1494 }
 0x801   : > { %2599 = vmatmul.mubr.msk.bf16.vlgmr.msra.gmra.mrb[28].mxu1 %vm802_vm2, %v1493_v40 }
 0x802   : > { %v1336_v45 = vmul.f32 %v2406_v42, %v1329_v43  ;;  %2610 = vmatprep.mubr.msk.bf16.mxu1 %vm3034_vm0, %v3033_v0 }
 0x804   : > { %v3572_v46 = vadd.f32 %v2407_v44, %v1336_v45 }
 0x806   : > { %v1438_v48 = vpack.c.bf16 %v3572_v46, %v3572_v46 }
 0x808   : > { %2581 = vmatmul.mubr.msk.bf16.vlgmr.msra.gmra.mrb[24].mxu0 %vm748_vm1, %v1438_v48 }
 0x809   : > { %2591 = vmatpush3.bf16.xpose.msra.mxu0 %v1562_v47  ;;  %2592 = vmatprep.mubr.msk.bf16.mxu0 %vm3034_vm0, %v3033_v0 }
 0x80a   : > { %2602 = vmatprep.subr.bf16.mxu0 %v3033_v0 }
 0x810   : > { %2593 = vmatmul.mubr.msk.bf16.vlgmr.msra.gmra.mrb[28].mxu0 %vm802_vm2, %v1491_v38 }
 0x811   : > { %2603 = vmatpush3.bf16.xpose.msra.mxu0 %v1654_v50  ;;  %2604 = vmatprep.mubr.msk.bf16.mxu0 %vm3034_vm0, %v3033_v0 }
 0x812   : > { %2614 = vmatprep.subr.bf16.mxu0 %v3033_v0 }
 0x818   : > { %2605 = vmatmul.mubr.msk.bf16.vlgmr.msra.gmra.mrb[32].mxu0 %vm802_vm2, %v1495_v51 }
 0x819   : > { %2616 = vmatprep.mubr.msk.bf16.mxu0 %vm3034_vm0, %v3033_v0 }
 0x83f   : > { %v1698_v52 = vpop.xlane.xlu0 %1697 }
 0x840   : > { %v1708_v54 = vsub.f32 %v1553_v26, %v1698_v52 }
 0x842   : > { %v1712_v60 = vmul.f32 1.442695, %v1708_v54 }
 0x844   : > { %2782 = vpow2.f32 %v1712_v60 }
 0x84e   : > { %v2783_v16 = vpop.eup %2782 }
 0x84f   : > { %v1720_v17 = vsel %vm802_vm2, %v2783_v16, 0.0 }
 0x8d4   : > { %v1644_v53 = vpop.f32.mrb[28].mxu1 }
 0x8d5   : > { %v1645_v55 = vadd.f32 %v1644_v53, %v3559_v1  ;;  %v2600_v56 = vpop.f32.mrb[29].mxu1 }
 0x8d6   : > { %v1647_v57 = vpop.f32.mrb[30].mxu1 }
 0x8d7   : > { %v1702_v58 = vsel %vm802_vm2, %v1645_v55, -inf  ;;  %v2601_v59 = vpop.f32.mrb[31].mxu1 }
 0x8d8   : > { %1703 = vmax.xlane.f32.xlu0 %v1702_v58 }
 0x8db   : > { %v1482_v61 = vpop.f32.mrb[24].mxu0 }
 0x8dc   : > { %v1504_v62 = vpack.c.bf16 %v1482_v61, %v1482_v61  ;;  %v2582_v63 = vpop.f32.mrb[25].mxu0 }
 0x8dd   : > { %v1485_v4 = vpop.f32.mrb[26].mxu0 }
 0x8de   : > { %v2583_v6 = vpop.f32.mrb[27].mxu0  ;;  %v1748_v7 = vsel %vm1046_vm3, %v1504_v62, 0 }
 0x8df   : > { %2609 = vmatpush3.bf16.msra.mxu1 %v1748_v7 }
 0x8e0   : > { %2620 = vmatprep.subr.bf16.mxu1 %v3033_v0 }
 0x8e3   : > { %v1598_v8 = vpop.f32.mrb[28].mxu0 }
 0x8e4   : > { %v1599_v9 = vadd.f32 %v1598_v8, %v3559_v1  ;;  %v2594_v11 = vpop.f32.mrb[29].mxu0 }
 0x8e5   : > { %v1601_v12 = vpop.f32.mrb[30].mxu0 }
 0x8e6   : > { %v2595_v14 = vpop.f32.mrb[31].mxu0  ;;  %v1699_v15 = vsel %vm802_vm2, %v1599_v9, -inf }
 0x8e7   : > { %1700 = vmax.xlane.f32.xlu1 %v1699_v15 }
 0x8eb   : > { %1721 = vadd.xlane.f32.xlu1 %v1720_v17  ;;  %v1690_v18 = vpop.f32.mrb[32].mxu0 }
 0x8ec   : > { %v1691_v13 = vadd.f32 %v1690_v18, %v3559_v1  ;;  %v2606_v19 = vpop.f32.mrb[33].mxu0 }
 0x8ed   : > { %v1693_v20 = vpop.f32.mrb[34].mxu0 }
 0x8ee   : > { %v2607_v3 = vpop.f32.mrb[35].mxu0  ;;  %v1705_v10 = vsel %vm802_vm2, %v1691_v13, -inf }
 0x8ef   : > { %1706 = vmax.xlane.f32.xlu0 %v1705_v10 }
 0x965   : > { %v1704_v21 = vpop.xlane.xlu0 %1703 }
 0x966   : > { %v1710_v22 = vsub.f32 %v1645_v55, %v1704_v21 }
 0x968   : > { %v1716_v23 = vmul.f32 1.442695, %v1710_v22 }
 0x96a   : > { %2784 = vpow2.f32 %v1716_v23 }
 0x974   : > { %v2785_v24 = vpop.eup %2784  ;;  %v1701_v25 = vpop.xlane.xlu1 %1700 }
 0x975   : > { %v1709_v26 = vsub.f32 %v1599_v9, %v1701_v25  ;;  %v1726_v27 = vsel %vm802_vm2, %v2785_v24, 0.0 }
 0x976   : > { %1727 = vadd.xlane.f32.xlu1 %v1726_v27 }
 0x977   : > { %v1714_v28 = vmul.f32 1.442695, %v1709_v26 }
 0x978   : > { %v1722_v2 = vpop.xlane.xlu1 %1721 }
 0x979   : > { %2786 = vpow2.f32 %v1714_v28 }
 0x97a   : > { %2788 = vrcp.f32 %v1722_v2 }
 0x97c   : > { %v1707_v1 = vpop.xlane.xlu0 %1706 }
 0x97d   : > { %v1711_v29 = vsub.f32 %v1691_v13, %v1707_v1 }
 0x97f   : > { %v1718_v30 = vmul.f32 1.442695, %v1711_v29 }
 0x981   : > { %2790 = vpow2.f32 %v1718_v30  ;;  %v2758_v30 = vld [vmem:[%s3746_s14] sm:$0xff]  }
 0x983   : > { %v2787_v31 = vpop.eup %2786 }
 0x984   : > { %v2789_v32 = vpop.eup %2788  ;;  %v1723_v33 = vsel %vm802_vm2, %v2787_v31, 0.0 }
 0x985   : > { %v1736_v36 = vmul.f32 %v2789_v32, %v2783_v16  ;;  %1724 = vadd.xlane.f32.xlu0 %v1723_v33 }
 0x987   : > { %1506 = vrot.lane.b32.xlu1 %v1504_v62, %s3036_s19  ;;  %v1740_v37 = vpack.c.bf16 %v1736_v36, %v1736_v36 }
 0x989   : > { %2611 = vmatmul.mubr.msk.bf16.vlgmr.msra.gmra.mrb[32].mxu1 %vm802_vm2, %v1740_v37 }
 0x98a   : > { %2622 = vmatprep.mubr.msk.bf16.mxu1 %vm3034_vm0, %v3033_v0 }
 0x98b   : > { %v2791_v38 = vpop.eup %2790  ;;  %1510 = vrot.lane.b32.xlu1 %v1504_v62, %s3035_s6  ;;  %s2214_s6 = sshll.u32 %s707_s23, 4  ;;  %s3689_s6 = int_to_ptr.vmem [resolvable:$true] %s2214_s6 }
 0x98c   : > { %v1729_v39 = vsel %vm802_vm2, %v2791_v38, 0.0  ;;  %s2946_s22 = scalar_lea.vmem %s3689_s6, 128  ;;  %p2953_p8 = scmp.lt.s32.totalorder %s3689_s6, %s2951_s9 }
 0x98d   : > { %1730 = vadd.xlane.f32.xlu0 %v1729_v39  ;;  %p2947_p2 = scmp.ne.s32.totalorder %s3689_s6, %s2946_s22 }
 0x98f   : > { %p2948_p4 = pnand %p2947_p2, %p3800_p1 }
 0x991   : > { %p2949_p0 = pneg %p2948_p4 }
 0x9a3   : > { %1508 = vrot.lane.b32.xlu0 %v1504_v62, %s3038_s2 }
 0xa03   : > { %v1728_v40 = vpop.xlane.xlu1 %1727 }
 0xa04   : > { %2792 = vrcp.f32 %v1728_v40  ;;  %v2421_v40 = vld [vmem:[%s3794_s26] ss:$0 sm:$0xff]  ;;  %s3798_s26 = sld [smem:[#allocation28_spill]] }
 0xa07   : > { %v1507_v41 = vpop.permute.xlu1 %1506 }
 0xa08   : > { %v1794_v42 = vsel %vm1046_vm3, %v1507_v41, 0 }
 0xa09   : > { %2615 = vmatpush3.bf16.msra.mxu0 %v1794_v42 }
 0xa0a   : > { %2626 = vmatprep.subr.bf16.mxu0 %v3033_v0 }
 0xa0b   : > { %v1511_v51 = vpop.permute.xlu1 %1510 }
 0xa0c   : > { %v1886_v55 = vsel %vm1046_vm3, %v1511_v51, 0 }
 0xa0e   : > { %v2793_v44 = vpop.eup %2792 }
 0xa0f   : > { %v1738_v48 = vmul.f32 %v2793_v44, %v2785_v24  ;;  %v2762_v44 = vld [vmem:[%s3748_s16 + $0x10] sm:$0xff]  }
 0xa11   : > { %v1742_v54 = vpack.c.bf16 %v1738_v48, %v1738_v48 }
 0xa12   : > { %v1725_v43 = vpop.xlane.xlu0 %1724 }
 0xa13   : > { %2794 = vrcp.f32 %v1725_v43 }
 0xa1a   : > { %v1731_v45 = vpop.xlane.xlu0 %1730 }
 0xa1b   : > { %2796 = vrcp.f32 %v1731_v45  ;;  %v2763_v45 = vld [vmem:[%s3748_s16 + $0x18] sm:$0xff]  }
 0xa1d   : > { %v2795_v47 = vpop.eup %2794 }
 0xa1e   : > { %v1737_v49 = vmul.f32 %v2795_v47, %v2787_v31  ;;  %v1509_v50 = vpop.permute.xlu0 %1508  ;;  %v2761_v31 = vld [vmem:[%s3748_s16 + $0x8] sm:$0xff]  }
 0xa1f   : > { %v1840_v52 = vsel %vm1046_vm3, %v1509_v50, 0 }
 0xa20   : > { %2621 = vmatpush3.bf16.msra.mxu1 %v1840_v52  ;;  %v1741_v53 = vpack.c.bf16 %v1737_v49, %v1737_v49 }
 0xa21   : > { %2632 = vmatprep.subr.bf16.mxu1 %v3033_v0 }
 0xa22   : > { %2617 = vmatmul.mubr.msk.bf16.vlgmr.msra.gmra.mrb[36].mxu0 %vm802_vm2, %v1741_v53 }
 0xa23   : > { %2627 = vmatpush3.bf16.msra.mxu0 %v1886_v55  ;;  %2623 = vmatmul.mubr.msk.bf16.vlgmr.msra.gmra.mrb[36].mxu1 %vm802_vm2, %v1742_v54 }
 0xa24   : > { %2628 = vmatprep.mubr.msk.bf16.mxu0 %vm3034_vm0, %v3033_v0  ;;  %2633 = vmatpush3.bf16.msra.mxu1 %v3495_v34 }
 0xa25   : > { %v2797_v56 = vpop.eup %2796  ;;  %2634 = vmatprep.subr.bf16.mxu1 %v3033_v0  ;;  %2636 = vmatprep.mubr.msk.bf16.mxu1 %vm3034_vm0, %v3033_v0 }
 0xa26   : > { %v1739_v57 = vmul.f32 %v2797_v56, %v2791_v38  ;;  %2640 = vmatprep.subr.bf16.mxu0 %v3033_v0  ;;  %v2420_v38 = vld [vmem:[%s3793_s25] ss:$0 sm:$0xff]  ;;  %s3797_s25 = sld [smem:[#allocation27_spill]] }
 0xa28   : > { %v1743_v58 = vpack.c.bf16 %v1739_v57, %v1739_v57  ;;  %2635 = vmatpush3.bf16.msra.mxu1 %v3499_v35 }
 0xa29   : > { %2648 = vmatprep.subr.bf16.mxu1 %v3033_v0 }
 0xa2a   : > { %2629 = vmatmul.mubr.msk.bf16.vlgmr.msra.gmra.mrb[40].mxu0 %vm802_vm2, %v1743_v58 }
 0xa2b   : > { %2644 = vmatprep.mubr.msk.bf16.mxu0 %vm3034_vm0, %v3033_v0  ;;  %2641 = vmatpush3.bf16.msra.mxu0 %v2758_v30 }
 0xa2c   : > { %2642 = vmatprep.subr.bf16.mxu0 %v3033_v0 }
 0xa5c   : > { %v1784_v34 = vpop.f32.mrb[32].mxu1 }
 0xa5d   : > { %v2612_v59 = vpop.f32.mrb[33].mxu1 }
 0xa5e   : > { %v1787_v60 = vpop.f32.mrb[34].mxu1 }
 0xa5f   : > { %v2613_v61 = vpop.f32.mrb[35].mxu1 }
 0xaf5   : > { %v1830_v62 = vpop.f32.mrb[36].mxu0 }
 0xaf6   : > { %v1876_v63 = vpop.f32.mrb[36].mxu1  ;;  %1929 = vrot.lane.b32.xlu1 %v1830_v62, %s3040_s24  ;;  %v2618_v4 = vpop.f32.mrb[37].mxu0  ;;  %s3799_s24 = sld [smem:[#allocation31_spill]] }
 0xaf7   : > { %1933 = vrot.lane.b32.xlu0 %v1876_v63, %s3041_s21  ;;  %v1833_v6 = vpop.f32.mrb[38].mxu0  ;;  %v2624_v35 = vpop.f32.mrb[37].mxu1  ;;  %s3795_s21 = sld [smem:[#allocation29_spill]] }
 0xaf8   : > { %v2619_v7 = vpop.f32.mrb[39].mxu0  ;;  %v1879_v8 = vpop.f32.mrb[38].mxu1 }
 0xaf9   : > { %v2625_v9 = vpop.f32.mrb[39].mxu1 }
 0xafd   : > { %v1922_v11 = vpop.f32.mrb[40].mxu0  ;;  %v2422_v47 = vld [vmem:[%s3795_s21] ss:$0 sm:$0xff]  ;;  %s3687_s21 = scalar_lea.hbm %s3799_s24, %s2435_s13 }
 0xafe   : > { %1937 = vrot.lane.b32.xlu1 %v1922_v11, %s3042_s17  ;;  %v2630_v12 = vpop.f32.mrb[41].mxu0  ;;  %s3796_s17 = sld [smem:[#allocation30_spill]]  ;;  %v2432_v11 = vld [vmem:[%s3797_s25] ss:$0 sm:$0xff] }
 0xaff   : > { %v1925_v14 = vpop.f32.mrb[42].mxu0 }
 0xb00   : > { %v2631_v15 = vpop.f32.mrb[43].mxu0  ;;  %v2433_v14 = vld [vmem:[%s3798_s26] ss:$0 sm:$0xff] }
 0xb68   : > { %v1930_v16 = vpop.permute.xlu1 %1929 }
 0xb69   : > { %v1940_v17 = vsel %vm802_vm2, %v1784_v34, %v1930_v16  ;;  %v1934_v18 = vpop.permute.xlu0 %1933 }
 0xb6a   : > { %v1941_v13 = vsel %vm1247_vm4, %v1940_v17, %v1934_v18 }
 0xb70   : > { %v1938_v19 = vpop.permute.xlu1 %1937 }
 0xb71   : > { %v1942_v20 = vsel %vm1249_vm5, %v1941_v13, %v1938_v19 }
 0xb72   : > { %v1943_v3 = vpack.c.bf16 %v1942_v20, %v1942_v20 }
 0xb74   : > { %2637 = vmatmul.mubr.msk.bf16.vlgmr.msra.gmra.mrb[40].mxu1 %vm748_vm1, %v1943_v3 }
 0xb75   : > { %2656 = vmatprep.mubr.msk.bf16.mxu1 %vm3034_vm0, %v3033_v0 }
 0xc47   : > { %v1981_v10 = vpop.f32.mrb[40].mxu1 }
 0xc48   : > { %v1982_v21 = vadd.f32 %v3535_v5, %v1981_v10  ;;  %v2638_v22 = vpop.f32.mrb[41].mxu1  ;;  %v2759_v5 = vld [vmem:[%s3746_s14 + $0x8] sm:$0xff]  }
 0xc49   : > { %v1984_v23 = vpop.f32.mrb[42].mxu1  ;;  %2643 = vmatpush3.bf16.msra.mxu0 %v2759_v5 }
 0xc4a   : > { %v2639_v24 = vpop.f32.mrb[43].mxu1  ;;  %v1987_v25 = vadd.f32 %v1982_v21, %v3572_v46  ;;  %v2760_v46 = vld [vmem:[%s3748_s16] sm:$0xff]  }
 0xc4b   : > { %2649 = vmatpush3.bf16.msra.mxu1 %v2760_v46 }
 0xc4c   : > { %v1990_v26 = vsel %vm748_vm1, %v1987_v25, 0.0  ;;  %2650 = vmatprep.subr.bf16.mxu1 %v3033_v0 }
 0xc4d   : > { %1991 = vadd.xlane.f32.xlu0 %v1990_v26 }
 0xc4f   : > { %2651 = vmatpush3.bf16.msra.mxu1 %v2761_v31 }
 0xc50   : > { %2652 = vmatprep.subr.bf16.mxu1 %v3033_v0 }
 0xc53   : > { %2653 = vmatpush3.bf16.msra.mxu1 %v2762_v44 }
 0xc54   : > { %2654 = vmatprep.subr.bf16.mxu1 %v3033_v0  ;;  %v2426_v0 = vld [vmem:[%s3796_s17] ss:$0 sm:$0xff]  ;;  %s2952_s17 = scalar_lea.vmem %s2951_s9, 256 }
 0xc55   : > { %p2954_p6 = scmp.lt.s32.totalorder %s2952_s17, %s2946_s22 }
 0xc57   : > { %2655 = vmatpush3.bf16.msra.mxu1 %v2763_v45  ;;  %p2955_p10 = por %p2954_p6, %p2953_p8 }
 0xc59   : > { %p2956_p13 = pnand %p2955_p10, %p2949_p0 }
 0xcda   : > { %v1992_v27 = vpop.xlane.xlu0 %1991 }
 0xcdb   : > { %v1993_v28 = vmul.f32 0.03125, %v1992_v27 }
 0xcdd   : > { %v1994_v2 = vsub.f32 %v1987_v25, %v1993_v28 }
 0xcdf   : > { %v1995_v1 = vmul.f32 %v1994_v2, %v1994_v2 }
 0xce1   : > { %v1996_v29 = vsel %vm748_vm1, %v1995_v1, 0.0 }
 0xce2   : > { %1997 = vadd.xlane.f32.xlu1 %v1996_v29 }
 0xd6f   : > { %v1998_v32 = vpop.xlane.xlu1 %1997 }
 0xd70   : > { %v1999_v33 = vmul.f32 0.03125, %v1998_v32 }
 0xd72   : > { %v2000_v36 = vadd.f32 1e-05, %v1999_v33 }
 0xd74   : > { %2798 = vrsqrt.f32 %v2000_v36 }
 0xd7e   : > { %v2799_v37 = vpop.eup %2798 }
 0xd7f   : > { %v2002_v39 = vmul.f32 %v2799_v37, %v1994_v2 }
 0xd81   : > { %v2009_v41 = vmul.f32 %v2420_v38, %v2002_v39 }
 0xd83   : > { %v2016_v42 = vadd.f32 %v2421_v40, %v2009_v41 }
 0xd85   : > { %v2017_v43 = vpack.c.bf16 %v2016_v42, %v2016_v42 }
 0xd87   : > { %2645 = vmatmul.mubr.msk.bf16.vlgmr.msra.gmra.mrb[44].mxu0 %vm748_vm1, %v2017_v43 }
 0xe5a   : > { %v2078_v48 = vpop.f32.mrb[44].mxu0 }
 0xe5b   : > { %v2079_v49 = vadd.f32 %v2422_v47, %v2078_v48  ;;  %v2646_v50 = vpop.f32.mrb[45].mxu0 }
 0xe5c   : > { %v2081_v51 = vpop.f32.mrb[46].mxu0 }
 0xe5d   : > { %v2084_v52 = vmax.f32 %v2079_v49, 0.0  ;;  %v2647_v53 = vpop.f32.mrb[47].mxu0 }
 0xe5f   : > { %v2085_v54 = vpack.c.bf16 %v2084_v52, %v2084_v52 }
 0xe61   : > { %2657 = vmatmul.mubr.msk.bf16.vlgmr.msra.gmra.mrb[44].mxu1 %vm2125_vm6, %v2085_v54 }
 0xf34   : > { %v2163_v55 = vpop.f32.mrb[44].mxu1 }
 0xf35   : > { %v2164_v56 = vadd.f32 %v2426_v0, %v2163_v55  ;;  %v2658_v57 = vpop.f32.mrb[45].mxu1 }
 0xf36   : > { %v2166_v58 = vpop.f32.mrb[46].mxu1 }
 0xf37   : > { %v2659_v34 = vpop.f32.mrb[47].mxu1  ;;  %v2169_v59 = vadd.f32 %v2164_v56, %v2016_v42 }
 0xf39   : > { %v2172_v60 = vsel %vm748_vm1, %v2169_v59, 0.0 }
 0xf3a   : > { %2173 = vadd.xlane.f32.xlu0 %v2172_v60 }
 0xfc7   : > { %v2174_v61 = vpop.xlane.xlu0 %2173 }
 0xfc8   : > { %v2175_v62 = vmul.f32 0.03125, %v2174_v61 }
 0xfca   : > { %v2176_v63 = vsub.f32 %v2169_v59, %v2175_v62 }
 0xfcc   : > { %v2177_v4 = vmul.f32 %v2176_v63, %v2176_v63 }
 0xfce   : > { %v2178_v6 = vsel %vm748_vm1, %v2177_v4, 0.0 }
 0xfcf   : > { %2179 = vadd.xlane.f32.xlu0 %v2178_v6 }
0x105c   : > { %v2180_v35 = vpop.xlane.xlu0 %2179 }
0x105d   : > { %v2181_v7 = vmul.f32 0.03125, %v2180_v35 }
0x105f   : > { %v2182_v8 = vadd.f32 1e-05, %v2181_v7 }
0x1061   : > { %2800 = vrsqrt.f32 %v2182_v8 }
0x106b   : > { %v2801_v9 = vpop.eup %2800 }
0x106c   : > { %v2184_v12 = vmul.f32 %v2801_v9, %v2176_v63 }
0x106e   : > { %v2191_v15 = vmul.f32 %v2432_v11, %v2184_v12 }
0x1070   : > { %v2198_v16 = vadd.f32 %v2433_v14, %v2191_v15 }
0x1072   : > { %2199 = vst.msk [vmem:[%s707_s23] sm:$0xff] %vm748_vm1, %v2198_v16 }
0x1073   : > { %2959 = shalt.err (!%p2956_p13)
}
0x1074   : > { %s2960_s5 = scalar_lea.hbm %s3687_s21, 128  ;;  %s2964_s25 = scalar_lea.hbm %s3799_s24, 256 }
0x1075   : > { %p2961_p5 = scmp.ne.s32.totalorder %s3687_s21, %s2960_s5  ;;  %p2965_p3 = scmp.lt.u32.totalorder %s3687_s21, %s3799_s24 }
0x1076   : > { %p2966_p7 = scmp.lt.u32.totalorder %s2964_s25, %s2960_s5  ;;  %p2968_p2 = scmp.lt.u32.totalorder %s2960_s5, %s3687_s21 }
0x1077   : > { %p2962_p11 = pnand %p2961_p5, %p3800_p1 }
0x1078   : > { %p2967_p12 = por %p2966_p7, %p2965_p3 }
0x1079   : > { %p2963_p9 = pneg %p2962_p11 }
0x107a   : > { %p2969_p4 = por %p2968_p2, %p2967_p12 }
0x107c   : > { %p2970_p0 = pnand %p2969_p4, %p2963_p9 }
0x107e   : > { %2973 = shalt.err (!%p2970_p0)
}
0x107f   : > { %2676 = dma.vmem_to_hbm [thread:$0]  (%p3800_p1), %s3689_s6, 128, %s3687_s21, %s2201_s1  }
0x1080 PF: > { %s3801_s26 = sld [smem:[#allocation17_spill]]  ;;  %s3802_s13 = sld [smem:[#allocation18_spill]] }
0x1081   : > { %p3804_p6 = scmp.ge.s32.totalorder %s3024_s30, 2 }
0x1086   : > { %s2226_s23 = sand.u32 1, %s3801_s26   ;;  %p3803_p8 = scmp.ne.s32.totalorder %s3802_s13, 0 }
0x1087   : > { %s2227_s19 = scalar_lea.sflag [#allocation4], %s2226_s23 }
0x1088   : > { %p2696_p10 = pnand %p3804_p6, %p3803_p8 }
0x108a   : > { %3007 = dma.done.wait (!%p2696_p10), %s2227_s19, 128  }
0x108b   : > { %3009 = vsyncadd (!%p2696_p10), %s2227_s19, 4294967168  ;;  %p35_p13 = scmp.ge.s32.totalorder %s3270_s12, 4   ;;  %s3805_s27 = smov %s3016_s28 }
0x108c   : > { %s3806_s28 = smov %s3020_s29  ;;  %s3807_s29 = smov %s3280_s11 }
0x108d   : > { %s3808_s30 = smov %s3270_s12  ;;  %37 = sbr.rel (!%p35_p13) target bundleno = 22 (0x16), region = 171 }
0x1094   :  { %2232 = vsyncpa [#allocation3], 1 }
0x1095   :  { %2234 = vsyncpa [#allocation3 + $0x1], 1 }
0x1096   :  { %2235 = vsyncpa [#allocation6], 1 }
0x1097   :  { %2237 = vsyncpa [#allocation6 + $0x1], 1 }
0x1098   :  { %2238 = vsyncpa [#allocation9], 1 }
0x1099   :  { %2239 = vsyncpa [#allocation4], 1 }
0x109a   :  { %2241 = vsyncpa [#allocation4 + $0x1], 1 }

</bundles_post_ra>
